<compile_context>
chip_gen: v7x
topology: tpu7x:2x2x1
jax: 0.10.0
libtpu: 0.0.40
codegen_flags: <defaults>
</compile_context>

<pallas_src>
import jax
import jax.numpy as jnp
from jax.experimental import pallas as pl
from jax.experimental.pallas import tpu as pltpu

IN_FEATURES = 32   # SAC Q-net input = concat(state, action); LazyLinear infers this
H1 = 512
H2 = 256
OUT = 1


def _round_up(v, m):
    return (v + m - 1) // m * m


def qnet_kernel(x_ref, w1_ref, b1_ref, w2_ref, b2_ref, w3_ref, b3_ref, o_ref):
    # fc1 + ReLU: bf16 operands on the MXU, f32 accumulation, f32 epilogue.
    x = x_ref[...].astype(jnp.bfloat16)
    h1 = jnp.dot(x, w1_ref[...], preferred_element_type=jnp.float32)
    h1 = jnp.maximum(h1 + b1_ref[...], 0.0)

    # fc2 + ReLU
    h2 = jnp.dot(h1.astype(jnp.bfloat16), w2_ref[...],
                 preferred_element_type=jnp.float32)
    h2 = jnp.maximum(h2 + b2_ref[...], 0.0)

    # fc3 (OUT=1): VPU multiply + XLU transpose (tile-aligned: bm and H2 are
    # multiples of 128) + sublane reduction -> a lane-dense (1, bm) row.
    # Keeps the 1-wide output off the MXU and off the masked 1-lane store path.
    prod_t = jnp.transpose(h2 * w3_ref[...])                    # (H2, bm)
    o = jnp.sum(prod_t, axis=0, keepdims=True) + b3_ref[...]    # (1, bm)
    o_ref[...] = o.astype(o_ref.dtype)


def prepare_params(params):
    """One-time cast/reshape of master f32 params into the kernel's format."""
    w1, b1, w2, b2, w3, b3 = params
    return (
        w1.astype(jnp.bfloat16),                    # (IN, H1)  MXU operand
        b1.reshape(1, H1).astype(jnp.float32),
        w2.astype(jnp.bfloat16),                    # (H1, H2)  MXU operand
        b2.reshape(1, H2).astype(jnp.float32),
        w3.reshape(H2, OUT).T.astype(jnp.float32),  # (1, H2)   VPU row
        b3.reshape(1, 1).astype(jnp.float32),
    )


def q_network_forward(x, kernel_params, *, block_m=2048):
    """Fused forward: ReLU(x@W1+b1) -> ReLU(.@W2+b2) -> .@W3+b3 -> (batch, 1)."""
    w1b, b1, w2b, b2, w3r, b3 = kernel_params
    batch, in_features = x.shape

    # Batch tile: multiple of 128 (lane-dense out block + tile-aligned in-kernel
    # transpose); >=2 tiles when batch > 128 so both v7x TCs get work; capped at
    # block_m to bound the bm*H1/bm*H2 f32 VMEM temporaries.
    ntiles = max(pl.cdiv(batch, block_m), 2) if batch > 128 else 1
    bm = min(block_m, _round_up(pl.cdiv(batch, ntiles), 128))
    if batch < bm:                      # only possible for batch < 128: tiny copy
        x = jnp.pad(x, ((0, bm - batch), (0, 0)))
    grid_n = pl.cdiv(batch, bm)         # ragged last block is clipped by Pallas
    padded = grid_n * bm

    flops = 2 * padded * (in_features * H1 + H1 * H2 + H2 * OUT)
    bytes_accessed = (
        batch * in_features * 4
        + w1b.size * 2 + w2b.size * 2
        + (b1.size + b2.size + w3r.size + b3.size) * 4
        + padded * 4)

    def resident(shape):
        return pl.BlockSpec(shape, lambda i: (0,) * len(shape))

    out = pl.pallas_call(
        qnet_kernel,
        out_shape=jax.ShapeDtypeStruct((1, padded), jnp.float32),
        grid=(grid_n,),
        in_specs=[
            pl.BlockSpec((bm, in_features), lambda i: (i, 0)),  # x: streamed
            resident(w1b.shape), resident(b1.shape),            # weights/biases
            resident(w2b.shape), resident(b2.shape),            # stay resident
            resident(w3r.shape), resident(b3.shape),            # in VMEM
        ],
        out_specs=pl.BlockSpec((1, bm), lambda i: (0, i)),      # lane-dense row
        compiler_params=pltpu.CompilerParams(
            dimension_semantics=("parallel",),       # v7x: 2 TCs split the batch
            vmem_limit_bytes=64 * 1024 * 1024),
        cost_estimate=pl.CostEstimate(
            flops=flops, transcendentals=0, bytes_accessed=bytes_accessed),
    )(x, w1b, b1, w2b, b2, w3r, b3)

    return out[0, :batch].reshape(batch, OUT)


def init_params(key):
    """Deterministic init mimicking torch.nn.Linear default (uniform +-1/sqrt(fan_in))."""
    def linear_init(k, fan_in, fan_out):
        kw, kb = jax.random.split(k)
        bound = 1.0 / jnp.sqrt(fan_in)
        w = jax.random.uniform(kw, (fan_in, fan_out), jnp.float32, -bound, bound)
        b = jax.random.uniform(kb, (fan_out,), jnp.float32, -bound, bound)
        return w, b

    k1, k2, k3 = jax.random.split(key, 3)
    w1, b1 = linear_init(k1, IN_FEATURES, H1)
    w2, b2 = linear_init(k2, H1, H2)
    w3, b3 = linear_init(k3, H2, OUT)
    return w1, b1, w2, b2, w3, b3


def reference_bf16(x, params):
    """Plain-JAX reference with the same bf16 weight/activation quantization as the kernel."""
    w1, b1, w2, b2, w3, b3 = params
    h1 = jnp.maximum(
        jnp.dot(x.astype(jnp.bfloat16), w1.astype(jnp.bfloat16),
                preferred_element_type=jnp.float32) + b1.reshape(1, -1), 0.0)
    h2 = jnp.maximum(
        jnp.dot(h1.astype(jnp.bfloat16), w2.astype(jnp.bfloat16),
                preferred_element_type=jnp.float32) + b2.reshape(1, -1), 0.0)
    return h2 @ w3 + b3.reshape(1, -1)


if __name__ == "__main__":
    key = jax.random.PRNGKey(0)
    k_params, k_x1, k_x2 = jax.random.split(key, 3)
    params = init_params(k_params)          # f32 master params
    kparams = prepare_params(params)        # one-time bf16/layout cast (not per call)

    # Small batch: single 128-row tile (x block clipped past row 4).
    x_small = jax.random.normal(k_x1, (4, IN_FEATURES), jnp.float32)
    out_small = jax.block_until_ready(q_network_forward(x_small, kparams))
    assert out_small.shape == (4, OUT)
    assert jnp.allclose(out_small, reference_bf16(x_small, params),
                        atol=2e-3, rtol=2e-3)

    # Batch exercising the multi-step grid + ragged last tile (300 -> 2 x 256 rows).
    x_big = jax.random.normal(k_x2, (300, IN_FEATURES), jnp.float32)
    out_big = jax.block_until_ready(q_network_forward(x_big, kparams))
    assert out_big.shape == (300, OUT)
    assert jnp.allclose(out_big, reference_bf16(x_big, params),
                        atol=2e-3, rtol=2e-3)

    # Loose sanity check against the full-f32 PyTorch math (W1/W2 are bf16-quantized).
    w1, b1, w2, b2, w3, b3 = params
    ref_f32 = jnp.maximum(jnp.maximum(x_small @ w1 + b1, 0.0) @ w2 + b2, 0.0) @ w3 + b3
    assert jnp.allclose(out_small, ref_f32, atol=1e-1, rtol=1e-1)

    print("KERNEL_OK")
</pallas_src>

<mosaic_0001>
module attributes {stable_mosaic.version = 11 : i64} {
  func.func @qnet_kernel(%arg0: i32, %arg1: memref<128x32xf32, #tpu.memory_space<vmem>>, %arg2: memref<32x512xbf16, #tpu.memory_space<vmem>>, %arg3: memref<1x512xf32, #tpu.memory_space<vmem>>, %arg4: memref<512x256xbf16, #tpu.memory_space<vmem>>, %arg5: memref<1x256xf32, #tpu.memory_space<vmem>>, %arg6: memref<1x256xf32, #tpu.memory_space<vmem>>, %arg7: memref<1x1xf32, #tpu.memory_space<vmem>>, %arg8: memref<1x128xf32, #tpu.memory_space<vmem>>) attributes {dimension_semantics = [#tpu.dimension_semantics<parallel>], iteration_bounds = array<i64: 1>, scalar_prefetch = 0 : i64, scratch_operands = 0 : i64, tpu.core_type = #tpu.core_type<tc>, window_params = [{transform_indices = @transform_0, window_bounds = array<i64: 128, 32>}, {pipeline_mode = #tpu.pipeline_mode<synchronous>, transform_indices = @transform_1, window_bounds = array<i64: 32, 512>}, {pipeline_mode = #tpu.pipeline_mode<synchronous>, transform_indices = @transform_2, window_bounds = array<i64: 1, 512>}, {pipeline_mode = #tpu.pipeline_mode<synchronous>, transform_indices = @transform_3, window_bounds = array<i64: 512, 256>}, {pipeline_mode = #tpu.pipeline_mode<synchronous>, transform_indices = @transform_4, window_bounds = array<i64: 1, 256>}, {pipeline_mode = #tpu.pipeline_mode<synchronous>, transform_indices = @transform_5, window_bounds = array<i64: 1, 256>}, {pipeline_mode = #tpu.pipeline_mode<synchronous>, transform_indices = @transform_6, window_bounds = array<i64: 1, 1>}, {transform_indices = @transform_7, window_bounds = array<i64: 1, 128>}]} {
    %c0 = arith.constant 0 : index
    %c0_0 = arith.constant 0 : index
    %0 = vector.load %arg1[%c0, %c0_0] : memref<128x32xf32, #tpu.memory_space<vmem>>, vector<128x32xf32>
    %1 = arith.truncf %0 : vector<128x32xf32> to vector<128x32xbf16>
    %c0_1 = arith.constant 0 : index
    %c0_2 = arith.constant 0 : index
    %2 = vector.load %arg2[%c0_1, %c0_2] : memref<32x512xbf16, #tpu.memory_space<vmem>>, vector<32x512xbf16>
    %cst = arith.constant dense<0.000000e+00> : vector<128x512xf32>
    %3 = tpu.matmul %1, %2, %cst {dimension_numbers = #tpu.dot_dimension_numbers<[1], [0], [0], [1], [0, 0, 1, 1], [], []>} : vector<128x32xbf16>, vector<32x512xbf16>, vector<128x512xf32> -> vector<128x512xf32>
    %c0_3 = arith.constant 0 : index
    %c0_4 = arith.constant 0 : index
    %4 = vector.load %arg3[%c0_3, %c0_4] : memref<1x512xf32, #tpu.memory_space<vmem>>, vector<1x512xf32>
    %5 = vector.broadcast %4 : vector<1x512xf32> to vector<128x512xf32>
    %6 = arith.addf %3, %5 : vector<128x512xf32>
    %cst_5 = arith.constant 0.000000e+00 : f32
    %7 = vector.broadcast %cst_5 : f32 to vector<128x512xf32>
    %8 = arith.maximumf %6, %7 : vector<128x512xf32>
    %9 = arith.truncf %8 : vector<128x512xf32> to vector<128x512xbf16>
    %c0_6 = arith.constant 0 : index
    %c0_7 = arith.constant 0 : index
    %10 = vector.load %arg4[%c0_6, %c0_7] : memref<512x256xbf16, #tpu.memory_space<vmem>>, vector<512x256xbf16>
    %cst_8 = arith.constant dense<0.000000e+00> : vector<128x256xf32>
    %11 = tpu.matmul %9, %10, %cst_8 {dimension_numbers = #tpu.dot_dimension_numbers<[1], [0], [0], [1], [0, 0, 1, 1], [], []>} : vector<128x512xbf16>, vector<512x256xbf16>, vector<128x256xf32> -> vector<128x256xf32>
    %c0_9 = arith.constant 0 : index
    %c0_10 = arith.constant 0 : index
    %12 = vector.load %arg5[%c0_9, %c0_10] : memref<1x256xf32, #tpu.memory_space<vmem>>, vector<1x256xf32>
    %13 = vector.broadcast %12 : vector<1x256xf32> to vector<128x256xf32>
    %14 = arith.addf %11, %13 : vector<128x256xf32>
    %cst_11 = arith.constant 0.000000e+00 : f32
    %15 = vector.broadcast %cst_11 : f32 to vector<128x256xf32>
    %16 = arith.maximumf %14, %15 : vector<128x256xf32>
    %c0_12 = arith.constant 0 : index
    %c0_13 = arith.constant 0 : index
    %17 = vector.load %arg6[%c0_12, %c0_13] : memref<1x256xf32, #tpu.memory_space<vmem>>, vector<1x256xf32>
    %18 = vector.broadcast %17 : vector<1x256xf32> to vector<128x256xf32>
    %19 = arith.mulf %16, %18 : vector<128x256xf32>
    %20 = tpu.transpose %19, [1, 0] : vector<128x256xf32> -> vector<256x128xf32>
    %cst_14 = arith.constant dense<0.000000e+00> : vector<128xf32>
    %21 = vector.multi_reduction <add>, %20, %cst_14 [0] : vector<256x128xf32> to vector<128xf32>
    %22 = vector.shape_cast %21 : vector<128xf32> to vector<1x128xf32>
    %c0_15 = arith.constant 0 : index
    %c0_16 = arith.constant 0 : index
    %23 = vector.load %arg7[%c0_15, %c0_16] : memref<1x1xf32, #tpu.memory_space<vmem>>, vector<1x1xf32>
    %24 = vector.broadcast %23 : vector<1x1xf32> to vector<1x128xf32>
    %25 = arith.addf %22, %24 : vector<1x128xf32>
    %c0_17 = arith.constant 0 : index
    %c0_18 = arith.constant 0 : index
    %26 = vector.load %arg8[%c0_17, %c0_18] : memref<1x128xf32, #tpu.memory_space<vmem>>, vector<1x128xf32>
    tpu.vector_store %arg8[%c0_17, %c0_18], %25 {strides = array<i32>} : memref<1x128xf32, #tpu.memory_space<vmem>>, vector<1x128xf32>,
    return
  }
  func.func @transform_0(%arg0: i32) -> (i32, i32) {
    %c0_i32 = arith.constant 0 : i32
    %c0_i32_0 = arith.constant 0 : i32
    return %arg0, %c0_i32 : i32, i32
  }
  func.func @transform_1(%arg0: i32) -> (i32, i32) {
    %c0_i32 = arith.constant 0 : i32
    %c0_i32_0 = arith.constant 0 : i32
    %c0_i32_1 = arith.constant 0 : i32
    return %c0_i32, %c0_i32_0 : i32, i32
  }
  func.func @transform_2(%arg0: i32) -> (i32, i32) {
    %c0_i32 = arith.constant 0 : i32
    %c0_i32_0 = arith.constant 0 : i32
    %c0_i32_1 = arith.constant 0 : i32
    return %c0_i32, %c0_i32_0 : i32, i32
  }
  func.func @transform_3(%arg0: i32) -> (i32, i32) {
    %c0_i32 = arith.constant 0 : i32
    %c0_i32_0 = arith.constant 0 : i32
    %c0_i32_1 = arith.constant 0 : i32
    return %c0_i32, %c0_i32_0 : i32, i32
  }
  func.func @transform_4(%arg0: i32) -> (i32, i32) {
    %c0_i32 = arith.constant 0 : i32
    %c0_i32_0 = arith.constant 0 : i32
    %c0_i32_1 = arith.constant 0 : i32
    return %c0_i32, %c0_i32_0 : i32, i32
  }
  func.func @transform_5(%arg0: i32) -> (i32, i32) {
    %c0_i32 = arith.constant 0 : i32
    %c0_i32_0 = arith.constant 0 : i32
    %c0_i32_1 = arith.constant 0 : i32
    return %c0_i32, %c0_i32_0 : i32, i32
  }
  func.func @transform_6(%arg0: i32) -> (i32, i32) {
    %c0_i32 = arith.constant 0 : i32
    %c0_i32_0 = arith.constant 0 : i32
    %c0_i32_1 = arith.constant 0 : i32
    return %c0_i32, %c0_i32_0 : i32, i32
  }
  func.func @transform_7(%arg0: i32) -> (i32, i32) {
    %c0_i32 = arith.constant 0 : i32
    %c0_i32_0 = arith.constant 0 : i32
    return %c0_i32, %arg0 : i32, i32
  }
}

</mosaic_0001>

<bundles_post_ra>
// kernel: tpu_custom_call.1
= control target key start
LH: loop header
LB: loop body
LE: loop exit
PB: predicated region body
PF: predicated region fallthrough
CT: control target
= control target key end

     0   :  { %s2140_s0 = inlined_call_operand.hbm [shape: f32[128,32], index: 0, kind: input, shape index: {}]   ;;  %s2141_s1 = inlined_call_operand.hbm [shape: bf16[32,512], index: 1, kind: input, shape index: {}]   ;;  %s2142_s2 = inlined_call_operand.hbm [shape: f32[1,512], index: 2, kind: input, shape index: {}]   ;;  %s2143_s3 = inlined_call_operand.hbm [shape: bf16[512,256], index: 3, kind: input, shape index: {}]   ;;  %s2144_s4 = inlined_call_operand.hbm [shape: f32[1,256], index: 4, kind: input, shape index: {}]   ;;  %s2145_s5 = inlined_call_operand.hbm [shape: f32[1,256], index: 5, kind: input, shape index: {}]   ;;  %s2146_s6 = inlined_call_operand.<no memory space> [shape: f32[1,1], index: 6, kind: input, shape index: {}]   ;;  %s2147_s7 = inlined_call_operand.hbm [shape: f32[1,128], index: 7, kind: output, shape index: {}]  }
   0x1   :  { %v12_v0 = vstv %s2146_s6 }
   0x2   :  { %13 = vst [vmem:[#allocation2] sm:$0x1] %v12_v0 }
   0x3   :  { %14 = vsyncpa [#allocation4], 0 }
   0x4   :  { %15 = vsyncpa [#allocation7], 0 }
   0x5   :  { %16 = vsyncpa [#allocation10], 0 }
   0x6   :  { %17 = vsyncpa [#allocation13], 0 }
   0x7   :  { %18 = vsyncpa [#allocation5], 0  ;;  %s1813_s26 = smov [#allocation6]   ;;  %s1649_s30 = scalar_lea.hbm %s2141_s1, 1024 }
   0x8   :  { %s36_s27 = sshll.u32 %s1813_s26, 4  ;;  %p1650_p0 = scmp.ne.s32.totalorder %s2141_s1, %s1649_s30  ;;  %s37_s27 = int_to_ptr.vmem [resolvable:$true] %s36_s27 }
   0x9   :  { %p1653_p1 = scmp.lt.u32.totalorder %s1649_s30, %s2141_s1 }
   0xb   :  { %p1655_p2 = pnand %p1653_p1, %p1650_p0 }
   0xd   :  { %1658 = shalt.err (!%p1655_p2)
}
   0xe   :  { %s1659_s6 = scalar_lea.vmem %s37_s27, 1024  ;;  %p1664_p4 = scmp.lt.s32.totalorder %s37_s27, %s37_s27 }
   0xf   :  { %p1660_p3 = scmp.ne.s32.totalorder %s37_s27, %s1659_s6  ;;  %p1665_p5 = scmp.lt.s32.totalorder %s1659_s6, %s1659_s6 }
  0x11   :  { %p1666_p6 = por %p1665_p5, %p1664_p4 }
  0x13   :  { %p1667_p7 = pnand %p1666_p6, %p1660_p3 }
  0x15   :  { %1670 = shalt.err (!%p1667_p7)
}
  0x16   :  { %s1814_s12 = smov 256   ;;  %s1815_s13 = smov 16  }
  0x17   :  { %42 = dma.hbm_to_vmem [thread:$0]  %s2141_s1, 1024, %s37_s27, [#allocation7], %s1814_s12, %s1814_s12, %s1815_s13  }
  0x18   :  { %s1816_s16 = smov [#allocation9]   ;;  %s1817_s18 = smov [#allocation3]  }
  0x19   :  { %s58_s17 = sshll.u32 %s1816_s16, 4  ;;  %s24_s19 = sshll.u32 %s1817_s18, 4  ;;  %s59_s17 = int_to_ptr.vmem [resolvable:$true] %s58_s17  ;;  %s25_s19 = int_to_ptr.vmem [resolvable:$true] %s24_s19 }
  0x1a   :  { %s1671_s22 = scalar_lea.hbm %s2143_s3, 8192 }
  0x1b   :  { %p1672_p8 = scmp.ne.s32.totalorder %s2143_s3, %s1671_s22  ;;  %p1675_p9 = scmp.lt.u32.totalorder %s1671_s22, %s2143_s3 }
  0x1d   :  { %p1677_p10 = pnand %p1675_p9, %p1672_p8 }
  0x1f   :  { %1680 = shalt.err (!%p1677_p10)
}
  0x20   :  { %s1681_s1 = scalar_lea.vmem %s59_s17, 8192  ;;  %p1686_p12 = scmp.lt.s32.totalorder %s59_s17, %s59_s17 }
  0x21   :  { %p1682_p11 = scmp.ne.s32.totalorder %s59_s17, %s1681_s1  ;;  %p1687_p13 = scmp.lt.s32.totalorder %s1681_s1, %s1681_s1 }
  0x23   :  { %p1688_p0 = por %p1687_p13, %p1686_p12 }
  0x25   :  { %p1689_p1 = pnand %p1688_p0, %p1682_p11 }
  0x27   :  { %1692 = shalt.err (!%p1689_p1)
}
  0x28   :  { %s1818_s27 = smov 128   ;;  %s1819_s28 = smov 8  }
  0x29   :  { %64 = dma.hbm_to_vmem [thread:$0]  %s2143_s3, 8192, %s59_s17, [#allocation10], %s1818_s27, %s1818_s27, %s1819_s28  }
  0x2a   :  { %s1693_s10 = scalar_lea.hbm %s2140_s0, 2048 }
  0x2b   :  { %p1694_p2 = scmp.ne.s32.totalorder %s2140_s0, %s1693_s10  ;;  %p1697_p3 = scmp.lt.u32.totalorder %s1693_s10, %s2140_s0 }
  0x2d   :  { %p1699_p4 = pnand %p1697_p3, %p1694_p2 }
  0x2f   :  { %1702 = shalt.err (!%p1699_p4)
}
  0x30   :  { %s1703_s14 = scalar_lea.vmem %s25_s19, 2048  ;;  %p1708_p6 = scmp.lt.s32.totalorder %s25_s19, %s25_s19 }
  0x31   :  { %p1704_p5 = scmp.ne.s32.totalorder %s25_s19, %s1703_s14  ;;  %p1709_p7 = scmp.lt.s32.totalorder %s1703_s14, %s1703_s14 }
  0x33   :  { %p1710_p8 = por %p1709_p7, %p1708_p6 }
  0x35   :  { %p1711_p9 = pnand %p1710_p8, %p1704_p5 }
  0x37   :  { %1714 = shalt.err (!%p1711_p9)
}
  0x38   :  { %30 = dma.hbm_to_vmem [thread:$0]  %s2140_s0, 2048, %s25_s19, [#allocation4], %s1818_s27, %s1818_s27, %s1819_s28  }
  0x39   :  { %s1820_s16 = smov [#allocation8]   ;;  %s1821_s18 = smov [#allocation11]  }
  0x3a   :  { %s49_s17 = sshll.u32 %s1820_s16, 4  ;;  %s71_s20 = sshll.u32 %s1821_s18, 4  ;;  %s50_s17 = int_to_ptr.vmem [resolvable:$true] %s49_s17  ;;  %s72_s20 = int_to_ptr.vmem [resolvable:$true] %s71_s20 }
  0x3b   :  { %s1715_s23 = scalar_lea.hbm %s2142_s2, 64 }
  0x3c   :  { %p1716_p10 = scmp.ne.s32.totalorder %s2142_s2, %s1715_s23  ;;  %p1719_p11 = scmp.lt.u32.totalorder %s1715_s23, %s2142_s2 }
  0x3e   :  { %p1721_p12 = pnand %p1719_p11, %p1716_p10 }
  0x40   :  { %1724 = shalt.err (!%p1721_p12)
}
  0x41   :  { %s1725_s0 = scalar_lea.vmem %s50_s17, 64  ;;  %p1730_p0 = scmp.lt.s32.totalorder %s50_s17, %s50_s17 }
  0x42   :  { %p1726_p13 = scmp.ne.s32.totalorder %s50_s17, %s1725_s0  ;;  %p1731_p1 = scmp.lt.s32.totalorder %s1725_s0, %s1725_s0 }
  0x44   :  { %p1732_p2 = por %p1731_p1, %p1730_p0 }
  0x46   :  { %p1733_p3 = pnand %p1732_p2, %p1726_p13 }
  0x48   :  { %1736 = shalt.err (!%p1733_p3)
}
  0x49   :  { %52 = dma.hbm_to_vmem [thread:$0]  %s2142_s2, 64, %s50_s17, [#allocation7]  }
  0x4a   :  { %s1737_s30 = scalar_lea.hbm %s2144_s4, 32 }
  0x4b   :  { %p1738_p4 = scmp.ne.s32.totalorder %s2144_s4, %s1737_s30  ;;  %p1741_p5 = scmp.lt.u32.totalorder %s1737_s30, %s2144_s4 }
  0x4d   :  { %p1743_p6 = pnand %p1741_p5, %p1738_p4 }
  0x4f   :  { %1746 = shalt.err (!%p1743_p6)
}
  0x50   :  { %s1747_s6 = scalar_lea.vmem %s72_s20, 32  ;;  %p1752_p8 = scmp.lt.s32.totalorder %s72_s20, %s72_s20 }
  0x51   :  { %p1748_p7 = scmp.ne.s32.totalorder %s72_s20, %s1747_s6  ;;  %p1753_p9 = scmp.lt.s32.totalorder %s1747_s6, %s1747_s6 }
  0x53   :  { %p1754_p10 = por %p1753_p9, %p1752_p8 }
  0x55   :  { %p1755_p11 = pnand %p1754_p10, %p1748_p7 }
  0x57   :  { %1758 = shalt.err (!%p1755_p11)
}
  0x58   :  { %74 = dma.hbm_to_vmem [thread:$0]  %s2144_s4, 32, %s72_s20, [#allocation10]  }
  0x59   :  { %s1822_s13 = smov [#allocation12]   ;;  %s1759_s16 = scalar_lea.hbm %s2145_s5, 32 }
  0x5a   :  { %s81_s14 = sshll.u32 %s1822_s13, 4  ;;  %p1760_p12 = scmp.ne.s32.totalorder %s2145_s5, %s1759_s16  ;;  %s82_s14 = int_to_ptr.vmem [resolvable:$true] %s81_s14 }
  0x5b   :  { %p1763_p13 = scmp.lt.u32.totalorder %s1759_s16, %s2145_s5 }
  0x5d   :  { %p1765_p0 = pnand %p1763_p13, %p1760_p12 }
  0x5f   :  { %1768 = shalt.err (!%p1765_p0)
}
  0x60   :  { %s1769_s23 = scalar_lea.vmem %s82_s14, 32  ;;  %p1774_p2 = scmp.lt.s32.totalorder %s82_s14, %s82_s14 }
  0x61   :  { %p1770_p1 = scmp.ne.s32.totalorder %s82_s14, %s1769_s23  ;;  %p1775_p3 = scmp.lt.s32.totalorder %s1769_s23, %s1769_s23 }
  0x63   :  { %p1776_p4 = por %p1775_p3, %p1774_p2 }
  0x65   :  { %p1777_p5 = pnand %p1776_p4, %p1770_p1 }
  0x67   :  { %1780 = shalt.err (!%p1777_p5)
}
  0x68   :  { %84 = dma.hbm_to_vmem [thread:$0]  %s2145_s5, 32, %s82_s14, [#allocation13]  }
  0x69   :  { %1803 = dma.done.wait [#allocation4], 2048  }
  0x6a   :  { %1804 = vsyncadd [#allocation4], 4294965248 }
  0x6b   :  { %1805 = dma.done.wait [#allocation7], 1088  }
  0x6c   :  { %1806 = vsyncadd [#allocation7], 4294966208 }
  0x6d   :  { %1807 = dma.done.wait [#allocation10], 8224  }
  0x6e   :  { %1808 = vsyncadd [#allocation10], 4294959072 }
  0x6f   :  { %1809 = dma.done.wait [#allocation13], 32  }
  0x70   :  { %1810 = vsyncadd [#allocation13], 4294967264  ;;  %v1823_v1 = vmov 0   ;;  %v1541_v2 = vld [vmem:[#allocation6 + $0x4] ss:$16 sps:$4 sm:$0xff]   ;;  %v107_v11 = vld [vmem:[#allocation3 + $0x8] sm:$0xff] }
  0x71   :  { %257 = vmatprep.mubr.bf16.mxu0 %v1823_v1  ;;  %370 = vmatprep.mubr.bf16.mxu1 %v1823_v1  ;;  %v1543_v3 = vld [vmem:[#allocation6 + $0xc] ss:$16 sps:$4 sm:$0xff]   ;;  %v1545_v4 = vld [vmem:[#allocation6] ss:$16 sps:$4 sm:$0xff]   ;;  %v1546_v5 = vld [vmem:[#allocation6 + $0x8] ss:$16 sps:$4 sm:$0xff]  }
  0x72   :  { %225 = vmatprep.subr.bf16.mxu0 %v1541_v2  ;;  %338 = vmatprep.subr.bf16.mxu1 %v1543_v3  ;;  %v1547_v6 = vld [vmem:[#allocation6 + $0x24] ss:$16 sps:$4 sm:$0xff]   ;;  %v1549_v7 = vld [vmem:[#allocation6 + $0x2c] ss:$16 sps:$4 sm:$0xff]   ;;  %v1551_v8 = vld [vmem:[#allocation6 + $0x20] ss:$16 sps:$4 sm:$0xff]  }
  0x73   :  { %226 = vmatpush1.bf16.msra.mxu0 %v1545_v4  ;;  %339 = vmatpush1.bf16.msra.mxu1 %v1546_v5  ;;  %v1552_v9 = vld [vmem:[#allocation6 + $0x28] ss:$16 sps:$4 sm:$0xff]   ;;  %v106_v10 = vld [vmem:[#allocation3] sm:$0xff]  ;;  %vm200_vm0 = vcmask 261120   ;;  %v108_v13 = vld [vmem:[#allocation3 + $0x10] sm:$0xff]  ;;  %s1824_s5 = smov [#allocation14]  }
  0x74   :  { %227 = vmatprep.subr.bf16.mxu0 %v1547_v6  ;;  %340 = vmatprep.subr.bf16.mxu1 %v1549_v7  ;;  %v122_v12 = vpack.c.bf16 %v107_v11, %v106_v10  ;;  %v109_v14 = vld [vmem:[#allocation3 + $0x18] sm:$0xff]  ;;  %v1553_v15 = vld [vmem:[#allocation9] ss:$8 sps:$4 sm:$0xff]   ;;  %v1555_v16 = vld [vmem:[#allocation9 + $0x4] ss:$8 sps:$4 sm:$0xff]   ;;  %s1364_s24 = sshll.u32 %s1824_s5, 4  ;;  %s1365_s24 = int_to_ptr.vmem [resolvable:$true] %s1364_s24 }
  0x75   :  { %v1556_v17 = vld [vmem:[#allocation9 + $0x100] ss:$8 sps:$4 sm:$0xff]   ;;  %v1558_v18 = vld [vmem:[#allocation9 + $0x104] ss:$8 sps:$4 sm:$0xff]   ;;  %v1559_v19 = vld [vmem:[#allocation9 + $0x10] ss:$8 sps:$4 sm:$0xff]   ;;  %v123_v21 = vpack.c.bf16 %v109_v14, %v108_v13  ;;  %p1786_p7 = scmp.lt.s32.totalorder %s1365_s24, %s1365_s24 }
  0x76   :  { %v1561_v20 = vld [vmem:[#allocation9 + $0x14] ss:$8 sps:$4 sm:$0xff]   ;;  %v1562_v23 = vld [vmem:[#allocation9 + $0x110] ss:$8 sps:$4 sm:$0xff]   ;;  %v1567_v24 = vld [vmem:[#allocation9 + $0x24] ss:$8 sps:$4 sm:$0xff]  }
  0x77   :  { %228 = vmatpush1.bf16.msra.mxu0 %v1551_v8  ;;  %341 = vmatpush1.bf16.msra.mxu1 %v1552_v9  ;;  %v1564_v22 = vld [vmem:[#allocation9 + $0x114] ss:$8 sps:$4 sm:$0xff]   ;;  %v1565_v25 = vld [vmem:[#allocation9 + $0x20] ss:$8 sps:$4 sm:$0xff]   ;;  %v1570_v26 = vld [vmem:[#allocation9 + $0x124] ss:$8 sps:$4 sm:$0xff]  }
  0x78   :  { %943 = vmatprep.subr.bf16.mxu1 %v1555_v16  ;;  %1056 = vmatprep.subr.bf16.mxu0 %v1558_v18  ;;  %v110_v27 = vld [vmem:[#allocation3 + $0x20] sm:$0xff]  ;;  %v111_v29 = vld [vmem:[#allocation3 + $0x28] sm:$0xff]  ;;  %v1571_v31 = vld [vmem:[#allocation9 + $0x30] ss:$8 sps:$4 sm:$0xff]   ;;  %s1781_s25 = scalar_lea.vmem %s1365_s24, 16  ;;  %s1785_s26 = scalar_lea.vmem %s1365_s24, 32 }
  0x79   :  { %v1573_v28 = vld [vmem:[#allocation9 + $0x34] ss:$8 sps:$4 sm:$0xff]   ;;  %v1568_v30 = vld [vmem:[#allocation9 + $0x120] ss:$8 sps:$4 sm:$0xff]   ;;  %v124_v33 = vpack.c.bf16 %v111_v29, %v110_v27  ;;  %v1574_v34 = vld [vmem:[#allocation9 + $0x130] ss:$8 sps:$4 sm:$0xff]   ;;  %p1782_p6 = scmp.ne.s32.totalorder %s1365_s24, %s1781_s25  ;;  %p1787_p8 = scmp.lt.s32.totalorder %s1785_s26, %s1781_s25 }
  0x7a   :  { %1384 = vmatmul.mubr.msk.bf16.vlgmr.msra.gmra.mrb[0].mxu0 %vm200_vm0, %v122_v12  ;;  %1392 = vmatmul.mubr.msk.bf16.vlgmr.msra.gmra.mrb[0].mxu1 %vm200_vm0, %v122_v12  ;;  %v1576_v32 = vld [vmem:[#allocation9 + $0x134] ss:$8 sps:$4 sm:$0xff]   ;;  %v1579_v35 = vld [vmem:[#allocation9 + $0x44] ss:$8 sps:$4 sm:$0xff]   ;;  %v1577_v36 = vld [vmem:[#allocation9 + $0x40] ss:$8 sps:$4 sm:$0xff]  }
  0x7b   :  { %267 = vmatprep.mubr.bf16.mxu0 %v1823_v1  ;;  %380 = vmatprep.mubr.bf16.mxu1 %v1823_v1  ;;  %v1582_v37 = vld [vmem:[#allocation9 + $0x144] ss:$8 sps:$4 sm:$0xff]   ;;  %v1585_v39 = vld [vmem:[#allocation9 + $0x54] ss:$8 sps:$4 sm:$0xff]   ;;  %v1580_v41 = vld [vmem:[#allocation9 + $0x140] ss:$8 sps:$4 sm:$0xff]   ;;  %p1788_p9 = por %p1787_p8, %p1786_p7 }
  0x7c   :  { %944 = vmatpush1.bf16.msra.mxu1 %v1553_v15  ;;  %1057 = vmatpush1.bf16.msra.mxu0 %v1556_v17  ;;  %v112_v38 = vld [vmem:[#allocation3 + $0x30] sm:$0xff]  ;;  %v113_v40 = vld [vmem:[#allocation3 + $0x38] sm:$0xff]  ;;  %v1589_v47 = vld [vmem:[#allocation9 + $0x60] ss:$8 sps:$4 sm:$0xff]  }
  0x7d   :  { %945 = vmatprep.subr.bf16.mxu1 %v1561_v20  ;;  %1058 = vmatprep.subr.bf16.mxu0 %v1564_v22  ;;  %v1583_v42 = vld [vmem:[#allocation9 + $0x50] ss:$8 sps:$4 sm:$0xff]   ;;  %v1588_v43 = vld [vmem:[#allocation9 + $0x154] ss:$8 sps:$4 sm:$0xff]   ;;  %v125_v44 = vpack.c.bf16 %v113_v40, %v112_v38  ;;  %v1591_v46 = vld [vmem:[#allocation9 + $0x64] ss:$8 sps:$4 sm:$0xff]   ;;  %p1789_p10 = pnand %p1788_p9, %p1782_p6 }
  0x7e   :  { %v1586_v45 = vld [vmem:[#allocation9 + $0x150] ss:$8 sps:$4 sm:$0xff]   ;;  %v1594_v48 = vld [vmem:[#allocation9 + $0x164] ss:$8 sps:$4 sm:$0xff]   ;;  %v114_v49 = vld [vmem:[#allocation3 + $0x40] sm:$0xff] }
  0x7f   :  { %v1597_v50 = vld [vmem:[#allocation9 + $0x74] ss:$8 sps:$4 sm:$0xff]   ;;  %v115_v51 = vld [vmem:[#allocation3 + $0x48] sm:$0xff]  ;;  %v1595_v53 = vld [vmem:[#allocation9 + $0x70] ss:$8 sps:$4 sm:$0xff]  }
  0x80   :  { %946 = vmatpush1.bf16.msra.mxu1 %v1559_v19  ;;  %1059 = vmatpush1.bf16.msra.mxu0 %v1562_v23  ;;  %v1592_v52 = vld [vmem:[#allocation9 + $0x160] ss:$8 sps:$4 sm:$0xff]   ;;  %v1600_v54 = vld [vmem:[#allocation9 + $0x174] ss:$8 sps:$4 sm:$0xff]   ;;  %v126_v55 = vpack.c.bf16 %v115_v51, %v114_v49  ;;  %v1598_v56 = vld [vmem:[#allocation9 + $0x170] ss:$8 sps:$4 sm:$0xff]  }
  0x81   :  { %947 = vmatprep.subr.bf16.mxu1 %v1567_v24  ;;  %1060 = vmatprep.subr.bf16.mxu0 %v1570_v26  ;;  %v1603_v57 = vld [vmem:[#allocation9 + $0x84] ss:$8 sps:$4 sm:$0xff]   ;;  %v1601_v58 = vld [vmem:[#allocation9 + $0x80] ss:$8 sps:$4 sm:$0xff]   ;;  %v1609_v61 = vld [vmem:[#allocation9 + $0x94] ss:$8 sps:$4 sm:$0xff]  }
  0x82   :  { %1385 = vmatmul.mubr.msk.bf16.gmra.mrb[4].mxu0 %vm200_vm0, %v123_v21  ;;  %1393 = vmatmul.mubr.msk.bf16.gmra.mrb[4].mxu1 %vm200_vm0, %v123_v21  ;;  %v1606_v59 = vld [vmem:[#allocation9 + $0x184] ss:$8 sps:$4 sm:$0xff]   ;;  %v117_v62 = vld [vmem:[#allocation3 + $0x58] sm:$0xff]  ;;  %v1604_v63 = vld [vmem:[#allocation9 + $0x180] ss:$8 sps:$4 sm:$0xff]  }
  0x83   :  { %277 = vmatprep.mubr.bf16.mxu0 %v1823_v1  ;;  %390 = vmatprep.mubr.bf16.mxu1 %v1823_v1  ;;  %v116_v60 = vld [vmem:[#allocation3 + $0x50] sm:$0xff]  ;;  %v1612_v2 = vld [vmem:[#allocation9 + $0x194] ss:$8 sps:$4 sm:$0xff]   ;;  %v1613_v6 = vld [vmem:[#allocation9 + $0xa0] ss:$8 sps:$4 sm:$0xff]  }
  0x84   :  { %948 = vmatpush1.bf16.msra.mxu1 %v1565_v25  ;;  %1061 = vmatpush1.bf16.msra.mxu0 %v1568_v30  ;;  %v1607_v0 = vld [vmem:[#allocation9 + $0x90] ss:$8 sps:$4 sm:$0xff]   ;;  %v127_v3 = vpack.c.bf16 %v117_v62, %v116_v60  ;;  %v1615_v5 = vld [vmem:[#allocation9 + $0xa4] ss:$8 sps:$4 sm:$0xff]   ;;  %v1621_v8 = vld [vmem:[#allocation9 + $0xb4] ss:$8 sps:$4 sm:$0xff]  }
  0x85   :  { %949 = vmatprep.subr.bf16.mxu1 %v1573_v28  ;;  %1062 = vmatprep.subr.bf16.mxu0 %v1576_v32  ;;  %v1610_v4 = vld [vmem:[#allocation9 + $0x190] ss:$8 sps:$4 sm:$0xff]   ;;  %v1618_v7 = vld [vmem:[#allocation9 + $0x1a4] ss:$8 sps:$4 sm:$0xff]   ;;  %v118_v9 = vld [vmem:[#allocation3 + $0x60] sm:$0xff] }
  0x86   :  { %v119_v10 = vld [vmem:[#allocation3 + $0x68] sm:$0xff]  ;;  %v1619_v12 = vld [vmem:[#allocation9 + $0xb0] ss:$8 sps:$4 sm:$0xff]   ;;  %v1624_v13 = vld [vmem:[#allocation9 + $0x1b4] ss:$8 sps:$4 sm:$0xff]  }
  0x87   :  { %v1616_v11 = vld [vmem:[#allocation9 + $0x1a0] ss:$8 sps:$4 sm:$0xff]   ;;  %v128_v14 = vpack.c.bf16 %v119_v10, %v118_v9  ;;  %v1622_v15 = vld [vmem:[#allocation9 + $0x1b0] ss:$8 sps:$4 sm:$0xff]   ;;  %v1627_v16 = vld [vmem:[#allocation9 + $0xc4] ss:$8 sps:$4 sm:$0xff]  }
  0x88   :  { %950 = vmatpush1.bf16.msra.mxu1 %v1571_v31  ;;  %1063 = vmatpush1.bf16.msra.mxu0 %v1574_v34  ;;  %v1625_v17 = vld [vmem:[#allocation9 + $0xc0] ss:$8 sps:$4 sm:$0xff]   ;;  %v1630_v18 = vld [vmem:[#allocation9 + $0x1c4] ss:$8 sps:$4 sm:$0xff]   ;;  %v1633_v19 = vld [vmem:[#allocation9 + $0xd4] ss:$8 sps:$4 sm:$0xff]  }
  0x89   :  { %951 = vmatprep.subr.bf16.mxu1 %v1579_v35  ;;  %1064 = vmatprep.subr.bf16.mxu0 %v1582_v37  ;;  %v120_v20 = vld [vmem:[#allocation3 + $0x70] sm:$0xff]  ;;  %v121_v21 = vld [vmem:[#allocation3 + $0x78] sm:$0xff]  ;;  %v1628_v22 = vld [vmem:[#allocation9 + $0x1c0] ss:$8 sps:$4 sm:$0xff]   ;;  %v140_v35 = vlaneseq }
  0x8a   :  { %1386 = vmatmul.mubr.msk.bf16.gmra.mrb[8].mxu0 %vm200_vm0, %v124_v33  ;;  %1394 = vmatmul.mubr.msk.bf16.gmra.mrb[8].mxu1 %vm200_vm0, %v124_v33  ;;  %v1631_v23 = vld [vmem:[#allocation9 + $0xd0] ss:$8 sps:$4 sm:$0xff]   ;;  %v1636_v24 = vld [vmem:[#allocation9 + $0x1d4] ss:$8 sps:$4 sm:$0xff]   ;;  %v129_v25 = vpack.c.bf16 %v121_v21, %v120_v20  ;;  %v1639_v27 = vld [vmem:[#allocation9 + $0xe4] ss:$8 sps:$4 sm:$0xff]  }
  0x8b   :  { %287 = vmatprep.mubr.bf16.mxu0 %v1823_v1  ;;  %400 = vmatprep.mubr.bf16.mxu1 %v1823_v1  ;;  %v1634_v26 = vld [vmem:[#allocation9 + $0x1d0] ss:$8 sps:$4 sm:$0xff]   ;;  %v1642_v28 = vld [vmem:[#allocation9 + $0x1e4] ss:$8 sps:$4 sm:$0xff]   ;;  %v1637_v29 = vld [vmem:[#allocation9 + $0xe0] ss:$8 sps:$4 sm:$0xff]  }
  0x8c   :  { %952 = vmatpush1.bf16.msra.mxu1 %v1577_v36  ;;  %1065 = vmatpush1.bf16.msra.mxu0 %v1580_v41  ;;  %v1640_v30 = vld [vmem:[#allocation9 + $0x1e0] ss:$8 sps:$4 sm:$0xff]   ;;  %v1645_v31 = vld [vmem:[#allocation9 + $0xf4] ss:$8 sps:$4 sm:$0xff]   ;;  %v1643_v33 = vld [vmem:[#allocation9 + $0xf0] ss:$8 sps:$4 sm:$0xff]  }
  0x8d   :  { %953 = vmatprep.subr.bf16.mxu1 %v1585_v39  ;;  %1066 = vmatprep.subr.bf16.mxu0 %v1588_v43  ;;  %v1648_v32 = vld [vmem:[#allocation9 + $0x1f4] ss:$8 sps:$4 sm:$0xff]   ;;  %v1646_v34 = vld [vmem:[#allocation9 + $0x1f0] ss:$8 sps:$4 sm:$0xff]   ;;  %v141_v36 = vshrl.u32 %v140_v35, 7 }
  0x8e   :  { %v138_v39 = vld [vmem:[#allocation8] sm:$0xf] }
  0x8f   :  { %v1972_v37 = vsub.s32 0, %v141_v36  ;;  %v150_v38 = vsub.s32 2, %v141_v36  ;;  %v1974_v40 = vsub.s32 1, %v141_v36  ;;  %v154_v41 = vsub.s32 3, %v141_v36 }
  0x90   :  { %954 = vmatpush1.bf16.msra.mxu1 %v1583_v42  ;;  %1067 = vmatpush1.bf16.msra.mxu0 %v1586_v45 }
  0x91   :  { %955 = vmatprep.subr.bf16.mxu1 %v1591_v46  ;;  %1068 = vmatprep.subr.bf16.mxu0 %v1594_v48  ;;  %v1977_v42 = vrot.slane %v138_v39, %v1972_v37  ;;  %v1979_v43 = vrot.slane %v138_v39, %v150_v38  ;;  %v1984_v45 = vrot.slane %v138_v39, %v154_v41 }
  0x92   :  { %1387 = vmatmul.mubr.msk.bf16.gmra.mrb[12].mxu0 %vm200_vm0, %v125_v44  ;;  %1395 = vmatmul.mubr.msk.bf16.gmra.mrb[12].mxu1 %vm200_vm0, %v125_v44  ;;  %v1982_v44 = vrot.slane %v138_v39, %v1974_v40 }
  0x93   :  { %297 = vmatprep.mubr.bf16.mxu0 %v1823_v1  ;;  %410 = vmatprep.mubr.bf16.mxu1 %v1823_v1 }
  0x94   :  { %956 = vmatpush1.bf16.msra.mxu1 %v1589_v47  ;;  %1069 = vmatpush1.bf16.msra.mxu0 %v1592_v52 }
  0x95   :  { %957 = vmatprep.subr.bf16.mxu1 %v1597_v50  ;;  %1070 = vmatprep.subr.bf16.mxu0 %v1600_v54 }
  0x98   :  { %958 = vmatpush1.bf16.msra.mxu1 %v1595_v53  ;;  %1071 = vmatpush1.bf16.msra.mxu0 %v1598_v56 }
  0x99   :  { %959 = vmatprep.subr.bf16.mxu1 %v1603_v57  ;;  %1072 = vmatprep.subr.bf16.mxu0 %v1606_v59 }
  0x9a   :  { %1388 = vmatmul.mubr.msk.bf16.gmra.mrb[16].mxu0 %vm200_vm0, %v126_v55  ;;  %1396 = vmatmul.mubr.msk.bf16.gmra.mrb[16].mxu1 %vm200_vm0, %v126_v55 }
  0x9b   :  { %307 = vmatprep.mubr.bf16.mxu0 %v1823_v1  ;;  %420 = vmatprep.mubr.bf16.mxu1 %v1823_v1 }
  0x9c   :  { %960 = vmatpush1.bf16.msra.mxu1 %v1601_v58  ;;  %1073 = vmatpush1.bf16.msra.mxu0 %v1604_v63 }
  0x9d   :  { %961 = vmatprep.subr.bf16.mxu1 %v1609_v61  ;;  %1074 = vmatprep.subr.bf16.mxu0 %v1612_v2 }
  0xa0   :  { %962 = vmatpush1.bf16.msra.mxu1 %v1607_v0  ;;  %1075 = vmatpush1.bf16.msra.mxu0 %v1610_v4 }
  0xa1   :  { %963 = vmatprep.subr.bf16.mxu1 %v1615_v5  ;;  %1076 = vmatprep.subr.bf16.mxu0 %v1618_v7 }
  0xa2   :  { %1389 = vmatmul.mubr.msk.bf16.gmra.mrb[20].mxu0 %vm200_vm0, %v127_v3  ;;  %1397 = vmatmul.mubr.msk.bf16.gmra.mrb[20].mxu1 %vm200_vm0, %v127_v3 }
  0xa3   :  { %317 = vmatprep.mubr.bf16.mxu0 %v1823_v1  ;;  %430 = vmatprep.mubr.bf16.mxu1 %v1823_v1 }
  0xa4   :  { %964 = vmatpush1.bf16.msra.mxu1 %v1613_v6  ;;  %1077 = vmatpush1.bf16.msra.mxu0 %v1616_v11 }
  0xa5   :  { %965 = vmatprep.subr.bf16.mxu1 %v1621_v8  ;;  %1078 = vmatprep.subr.bf16.mxu0 %v1624_v13 }
  0xa8   :  { %966 = vmatpush1.bf16.msra.mxu1 %v1619_v12  ;;  %1079 = vmatpush1.bf16.msra.mxu0 %v1622_v15 }
  0xa9   :  { %967 = vmatprep.subr.bf16.mxu1 %v1627_v16  ;;  %1080 = vmatprep.subr.bf16.mxu0 %v1630_v18 }
  0xaa   :  { %1390 = vmatmul.mubr.msk.bf16.gmra.mrb[24].mxu0 %vm200_vm0, %v128_v14  ;;  %1398 = vmatmul.mubr.msk.bf16.gmra.mrb[24].mxu1 %vm200_vm0, %v128_v14 }
  0xab   :  { %327 = vmatprep.mubr.bf16.mxu0 %v1823_v1  ;;  %440 = vmatprep.mubr.bf16.mxu1 %v1823_v1 }
  0xac   :  { %968 = vmatpush1.bf16.msra.mxu1 %v1625_v17  ;;  %1081 = vmatpush1.bf16.msra.mxu0 %v1628_v22 }
  0xad   :  { %969 = vmatprep.subr.bf16.mxu1 %v1633_v19  ;;  %1082 = vmatprep.subr.bf16.mxu0 %v1636_v24 }
  0xb0   :  { %970 = vmatpush1.bf16.msra.mxu1 %v1631_v23  ;;  %1083 = vmatpush1.bf16.msra.mxu0 %v1634_v26 }
  0xb1   :  { %971 = vmatprep.subr.bf16.mxu1 %v1639_v27  ;;  %1084 = vmatprep.subr.bf16.mxu0 %v1642_v28 }
  0xb2   :  { %1391 = vmatmul.mubr.msk.bf16.gmra.mrb[28].mxu0 %vm200_vm0, %v129_v25  ;;  %1399 = vmatmul.mubr.msk.bf16.gmra.mrb[28].mxu1 %vm200_vm0, %v129_v25 }
  0xb4   :  { %972 = vmatpush1.bf16.msra.mxu1 %v1637_v29  ;;  %1085 = vmatpush1.bf16.msra.mxu0 %v1640_v30 }
  0xb5   :  { %973 = vmatprep.subr.bf16.mxu1 %v1645_v31  ;;  %1086 = vmatprep.subr.bf16.mxu0 %v1648_v32 }
  0xb8   :  { %974 = vmatpush1.bf16.msra.mxu1 %v1643_v33  ;;  %1087 = vmatpush1.bf16.msra.mxu0 %v1646_v34 }
 0x14d   :  { %v259_v46 = vpop.f32.mrb[0].mxu0  ;;  %v372_v47 = vpop.f32.mrb[0].mxu1 }
 0x14e   :  { %v260_v48 = vadd.f32 %v259_v46, %v1977_v42  ;;  %v373_v49 = vadd.f32 %v372_v47, %v1979_v43  ;;  %v261_v50 = vpop.f32.mrb[1].mxu0  ;;  %v374_v51 = vpop.f32.mrb[1].mxu1 }
 0x14f   :  { %v262_v52 = vadd.f32 %v261_v50, %v1982_v44  ;;  %v375_v53 = vadd.f32 %v374_v51, %v1984_v45  ;;  %v263_v54 = vpop.f32.mrb[2].mxu0  ;;  %v376_v55 = vpop.f32.mrb[2].mxu1 }
 0x150   :  { %v453_v56 = vmax.f32 %v373_v49, 0.0  ;;  %v264_v57 = vadd.f32 %v263_v54, %v1977_v42  ;;  %v377_v58 = vadd.f32 %v376_v55, %v1979_v43  ;;  %v265_v59 = vpop.f32.mrb[3].mxu0  ;;  %v378_v60 = vpop.f32.mrb[3].mxu1  ;;  %v451_v0 = vmax.f32 %v260_v48, 0.0 }
 0x151   :  { %v454_v61 = vmax.f32 %v375_v53, 0.0  ;;  %v266_v62 = vadd.f32 %v265_v59, %v1982_v44  ;;  %v379_v63 = vadd.f32 %v378_v60, %v1984_v45  ;;  %v452_v4 = vmax.f32 %v262_v52, 0.0 }
 0x152   :  { %v455_v2 = vmax.f32 %v264_v57, 0.0  ;;  %v457_v3 = vmax.f32 %v377_v58, 0.0 }
 0x153   :  { %v456_v5 = vmax.f32 %v266_v62, 0.0  ;;  %v458_v6 = vmax.f32 %v379_v63, 0.0 }
 0x154   :  { %v515_v7 = vpack.c.bf16 %v455_v2, %v451_v0  ;;  %v517_v8 = vpack.c.bf16 %v457_v3, %v453_v56 }
 0x155   :  { %v516_v9 = vpack.c.bf16 %v456_v5, %v452_v4  ;;  %v518_v10 = vpack.c.bf16 %v458_v6, %v454_v61  ;;  %v269_v11 = vpop.f32.mrb[4].mxu0  ;;  %v382_v12 = vpop.f32.mrb[4].mxu1 }
 0x156   :  { %v270_v13 = vadd.f32 %v269_v11, %v1977_v42  ;;  %v383_v14 = vadd.f32 %v382_v12, %v1979_v43  ;;  %v271_v15 = vpop.f32.mrb[5].mxu0  ;;  %v384_v16 = vpop.f32.mrb[5].mxu1 }
 0x157   :  { %v272_v17 = vadd.f32 %v271_v15, %v1982_v44  ;;  %v385_v18 = vadd.f32 %v384_v16, %v1984_v45  ;;  %v273_v19 = vpop.f32.mrb[6].mxu0  ;;  %v386_v20 = vpop.f32.mrb[6].mxu1  ;;  %975 = vmatprep.mubr.bf16.mxu1 %v516_v9  ;;  %1088 = vmatprep.mubr.bf16.mxu0 %v518_v10 }
 0x158   :  { %v461_v21 = vmax.f32 %v383_v14, 0.0  ;;  %v274_v22 = vadd.f32 %v273_v19, %v1977_v42  ;;  %v387_v23 = vadd.f32 %v386_v20, %v1979_v43  ;;  %v275_v24 = vpop.f32.mrb[7].mxu0  ;;  %v388_v25 = vpop.f32.mrb[7].mxu1  ;;  %976 = vmatmul.mubr.bf16.vlgmr.msra.gmra.mrb[32].mxu1 %v515_v7  ;;  %1089 = vmatmul.mubr.bf16.vlgmr.msra.gmra.mrb[32].mxu0 %v517_v8  ;;  %v459_v29 = vmax.f32 %v270_v13, 0.0 }
 0x159   :  { %v462_v26 = vmax.f32 %v385_v18, 0.0  ;;  %v276_v27 = vadd.f32 %v275_v24, %v1982_v44  ;;  %v389_v28 = vadd.f32 %v388_v25, %v1984_v45  ;;  %v460_v32 = vmax.f32 %v272_v17, 0.0 }
 0x15a   :  { %v463_v30 = vmax.f32 %v274_v22, 0.0  ;;  %v465_v31 = vmax.f32 %v387_v23, 0.0 }
 0x15b   :  { %v464_v33 = vmax.f32 %v276_v27, 0.0  ;;  %v466_v34 = vmax.f32 %v389_v28, 0.0 }
 0x15c   :  { %v519_v35 = vpack.c.bf16 %v463_v30, %v459_v29  ;;  %v521_v36 = vpack.c.bf16 %v465_v31, %v461_v21 }
 0x15d   :  { %v520_v38 = vpack.c.bf16 %v464_v33, %v460_v32  ;;  %v522_v39 = vpack.c.bf16 %v466_v34, %v462_v26  ;;  %v279_v41 = vpop.f32.mrb[8].mxu0  ;;  %v392_v46 = vpop.f32.mrb[8].mxu1 }
 0x15e   :  { %v280_v47 = vadd.f32 %v279_v41, %v1977_v42  ;;  %v393_v48 = vadd.f32 %v392_v46, %v1979_v43  ;;  %v281_v49 = vpop.f32.mrb[9].mxu0  ;;  %v394_v50 = vpop.f32.mrb[9].mxu1 }
 0x15f   :  { %v282_v51 = vadd.f32 %v281_v49, %v1982_v44  ;;  %v395_v52 = vadd.f32 %v394_v50, %v1984_v45  ;;  %v283_v53 = vpop.f32.mrb[10].mxu0  ;;  %v396_v54 = vpop.f32.mrb[10].mxu1  ;;  %985 = vmatprep.mubr.bf16.mxu1 %v520_v38  ;;  %1098 = vmatprep.mubr.bf16.mxu0 %v522_v39 }
 0x160   :  { %v469_v55 = vmax.f32 %v393_v48, 0.0  ;;  %v284_v56 = vadd.f32 %v283_v53, %v1977_v42  ;;  %v397_v57 = vadd.f32 %v396_v54, %v1979_v43  ;;  %v285_v58 = vpop.f32.mrb[11].mxu0  ;;  %v398_v59 = vpop.f32.mrb[11].mxu1  ;;  %986 = vmatmul.mubr.bf16.gmra.mrb[36].mxu1 %v519_v35  ;;  %1099 = vmatmul.mubr.bf16.gmra.mrb[36].mxu0 %v521_v36  ;;  %v467_v63 = vmax.f32 %v280_v47, 0.0 }
 0x161   :  { %v470_v60 = vmax.f32 %v395_v52, 0.0  ;;  %v286_v61 = vadd.f32 %v285_v58, %v1982_v44  ;;  %v399_v62 = vadd.f32 %v398_v59, %v1984_v45  ;;  %v468_v3 = vmax.f32 %v282_v51, 0.0 }
 0x162   :  { %v471_v0 = vmax.f32 %v284_v56, 0.0  ;;  %v473_v2 = vmax.f32 %v397_v57, 0.0 }
 0x163   :  { %v472_v4 = vmax.f32 %v286_v61, 0.0  ;;  %v474_v5 = vmax.f32 %v399_v62, 0.0 }
 0x164   :  { %v523_v6 = vpack.c.bf16 %v471_v0, %v467_v63  ;;  %v525_v7 = vpack.c.bf16 %v473_v2, %v469_v55 }
 0x165   :  { %v524_v8 = vpack.c.bf16 %v472_v4, %v468_v3  ;;  %v526_v9 = vpack.c.bf16 %v474_v5, %v470_v60  ;;  %v289_v10 = vpop.f32.mrb[12].mxu0  ;;  %v402_v11 = vpop.f32.mrb[12].mxu1 }
 0x166   :  { %v290_v12 = vadd.f32 %v289_v10, %v1977_v42  ;;  %v403_v13 = vadd.f32 %v402_v11, %v1979_v43  ;;  %v291_v14 = vpop.f32.mrb[13].mxu0  ;;  %v404_v15 = vpop.f32.mrb[13].mxu1 }
 0x167   :  { %v292_v16 = vadd.f32 %v291_v14, %v1982_v44  ;;  %v405_v17 = vadd.f32 %v404_v15, %v1984_v45  ;;  %v293_v18 = vpop.f32.mrb[14].mxu0  ;;  %v406_v19 = vpop.f32.mrb[14].mxu1  ;;  %995 = vmatprep.mubr.bf16.mxu1 %v524_v8  ;;  %1108 = vmatprep.mubr.bf16.mxu0 %v526_v9 }
 0x168   :  { %v477_v20 = vmax.f32 %v403_v13, 0.0  ;;  %v294_v21 = vadd.f32 %v293_v18, %v1977_v42  ;;  %v407_v22 = vadd.f32 %v406_v19, %v1979_v43  ;;  %v295_v23 = vpop.f32.mrb[15].mxu0  ;;  %v408_v24 = vpop.f32.mrb[15].mxu1  ;;  %996 = vmatmul.mubr.bf16.gmra.mrb[40].mxu1 %v523_v6  ;;  %1109 = vmatmul.mubr.bf16.gmra.mrb[40].mxu0 %v525_v7  ;;  %v475_v28 = vmax.f32 %v290_v12, 0.0 }
 0x169   :  { %v478_v25 = vmax.f32 %v405_v17, 0.0  ;;  %v296_v26 = vadd.f32 %v295_v23, %v1982_v44  ;;  %v409_v27 = vadd.f32 %v408_v24, %v1984_v45  ;;  %v476_v31 = vmax.f32 %v292_v16, 0.0 }
 0x16a   :  { %v479_v29 = vmax.f32 %v294_v21, 0.0  ;;  %v481_v30 = vmax.f32 %v407_v22, 0.0 }
 0x16b   :  { %v480_v32 = vmax.f32 %v296_v26, 0.0  ;;  %v482_v33 = vmax.f32 %v409_v27, 0.0 }
 0x16c   :  { %v527_v34 = vpack.c.bf16 %v479_v29, %v475_v28  ;;  %v529_v35 = vpack.c.bf16 %v481_v30, %v477_v20 }
 0x16d   :  { %v528_v36 = vpack.c.bf16 %v480_v32, %v476_v31  ;;  %v530_v38 = vpack.c.bf16 %v482_v33, %v478_v25  ;;  %v299_v39 = vpop.f32.mrb[16].mxu0  ;;  %v412_v41 = vpop.f32.mrb[16].mxu1 }
 0x16e   :  { %v300_v46 = vadd.f32 %v299_v39, %v1977_v42  ;;  %v413_v47 = vadd.f32 %v412_v41, %v1979_v43  ;;  %v301_v48 = vpop.f32.mrb[17].mxu0  ;;  %v414_v49 = vpop.f32.mrb[17].mxu1 }
 0x16f   :  { %v302_v50 = vadd.f32 %v301_v48, %v1982_v44  ;;  %v415_v51 = vadd.f32 %v414_v49, %v1984_v45  ;;  %v303_v52 = vpop.f32.mrb[18].mxu0  ;;  %v416_v53 = vpop.f32.mrb[18].mxu1  ;;  %1005 = vmatprep.mubr.bf16.mxu1 %v528_v36  ;;  %1118 = vmatprep.mubr.bf16.mxu0 %v530_v38 }
 0x170   :  { %v485_v54 = vmax.f32 %v413_v47, 0.0  ;;  %v304_v55 = vadd.f32 %v303_v52, %v1977_v42  ;;  %v417_v56 = vadd.f32 %v416_v53, %v1979_v43  ;;  %v305_v57 = vpop.f32.mrb[19].mxu0  ;;  %v418_v58 = vpop.f32.mrb[19].mxu1  ;;  %1006 = vmatmul.mubr.bf16.gmra.mrb[44].mxu1 %v527_v34  ;;  %1119 = vmatmul.mubr.bf16.gmra.mrb[44].mxu0 %v529_v35  ;;  %v483_v62 = vmax.f32 %v300_v46, 0.0 }
 0x171   :  { %v486_v59 = vmax.f32 %v415_v51, 0.0  ;;  %v306_v60 = vadd.f32 %v305_v57, %v1982_v44  ;;  %v419_v61 = vadd.f32 %v418_v58, %v1984_v45  ;;  %v484_v2 = vmax.f32 %v302_v50, 0.0 }
 0x172   :  { %v487_v63 = vmax.f32 %v304_v55, 0.0  ;;  %v489_v0 = vmax.f32 %v417_v56, 0.0 }
 0x173   :  { %v488_v3 = vmax.f32 %v306_v60, 0.0  ;;  %v490_v4 = vmax.f32 %v419_v61, 0.0 }
 0x174   :  { %v531_v5 = vpack.c.bf16 %v487_v63, %v483_v62  ;;  %v533_v6 = vpack.c.bf16 %v489_v0, %v485_v54 }
 0x175   :  { %v532_v7 = vpack.c.bf16 %v488_v3, %v484_v2  ;;  %v534_v8 = vpack.c.bf16 %v490_v4, %v486_v59  ;;  %v309_v9 = vpop.f32.mrb[20].mxu0  ;;  %v422_v10 = vpop.f32.mrb[20].mxu1 }
 0x176   :  { %v310_v11 = vadd.f32 %v309_v9, %v1977_v42  ;;  %v423_v12 = vadd.f32 %v422_v10, %v1979_v43  ;;  %v311_v13 = vpop.f32.mrb[21].mxu0  ;;  %v424_v14 = vpop.f32.mrb[21].mxu1 }
 0x177   :  { %v312_v15 = vadd.f32 %v311_v13, %v1982_v44  ;;  %v425_v16 = vadd.f32 %v424_v14, %v1984_v45  ;;  %v313_v17 = vpop.f32.mrb[22].mxu0  ;;  %v426_v18 = vpop.f32.mrb[22].mxu1  ;;  %1015 = vmatprep.mubr.bf16.mxu1 %v532_v7  ;;  %1128 = vmatprep.mubr.bf16.mxu0 %v534_v8 }
 0x178   :  { %v493_v19 = vmax.f32 %v423_v12, 0.0  ;;  %v314_v20 = vadd.f32 %v313_v17, %v1977_v42  ;;  %v427_v21 = vadd.f32 %v426_v18, %v1979_v43  ;;  %v315_v22 = vpop.f32.mrb[23].mxu0  ;;  %v428_v23 = vpop.f32.mrb[23].mxu1  ;;  %1016 = vmatmul.mubr.bf16.gmra.mrb[48].mxu1 %v531_v5  ;;  %1129 = vmatmul.mubr.bf16.gmra.mrb[48].mxu0 %v533_v6  ;;  %v491_v27 = vmax.f32 %v310_v11, 0.0 }
 0x179   :  { %v494_v24 = vmax.f32 %v425_v16, 0.0  ;;  %v316_v25 = vadd.f32 %v315_v22, %v1982_v44  ;;  %v429_v26 = vadd.f32 %v428_v23, %v1984_v45  ;;  %v492_v30 = vmax.f32 %v312_v15, 0.0 }
 0x17a   :  { %v495_v28 = vmax.f32 %v314_v20, 0.0  ;;  %v497_v29 = vmax.f32 %v427_v21, 0.0 }
 0x17b   :  { %v496_v31 = vmax.f32 %v316_v25, 0.0  ;;  %v498_v32 = vmax.f32 %v429_v26, 0.0 }
 0x17c   :  { %v535_v33 = vpack.c.bf16 %v495_v28, %v491_v27  ;;  %v537_v34 = vpack.c.bf16 %v497_v29, %v493_v19 }
 0x17d   :  { %v536_v35 = vpack.c.bf16 %v496_v31, %v492_v30  ;;  %v538_v36 = vpack.c.bf16 %v498_v32, %v494_v24  ;;  %v319_v38 = vpop.f32.mrb[24].mxu0  ;;  %v432_v39 = vpop.f32.mrb[24].mxu1 }
 0x17e   :  { %v320_v41 = vadd.f32 %v319_v38, %v1977_v42  ;;  %v433_v46 = vadd.f32 %v432_v39, %v1979_v43  ;;  %v321_v47 = vpop.f32.mrb[25].mxu0  ;;  %v434_v48 = vpop.f32.mrb[25].mxu1  ;;  %v1201_v38 = vld [vmem:[#allocation12] sm:$0x3] }
 0x17f   :  { %v322_v49 = vadd.f32 %v321_v47, %v1982_v44  ;;  %v435_v50 = vadd.f32 %v434_v48, %v1984_v45  ;;  %v323_v51 = vpop.f32.mrb[26].mxu0  ;;  %v436_v52 = vpop.f32.mrb[26].mxu1  ;;  %1025 = vmatprep.mubr.bf16.mxu1 %v536_v35  ;;  %1138 = vmatprep.mubr.bf16.mxu0 %v538_v36 }
 0x180   :  { %v501_v53 = vmax.f32 %v433_v46, 0.0  ;;  %v324_v54 = vadd.f32 %v323_v51, %v1977_v42  ;;  %v437_v55 = vadd.f32 %v436_v52, %v1979_v43  ;;  %v325_v56 = vpop.f32.mrb[27].mxu0  ;;  %v438_v57 = vpop.f32.mrb[27].mxu1  ;;  %1026 = vmatmul.mubr.bf16.gmra.mrb[52].mxu1 %v535_v33  ;;  %1139 = vmatmul.mubr.bf16.gmra.mrb[52].mxu0 %v537_v34  ;;  %v499_v61 = vmax.f32 %v320_v41, 0.0 }
 0x181   :  { %v502_v58 = vmax.f32 %v435_v50, 0.0  ;;  %v326_v59 = vadd.f32 %v325_v56, %v1982_v44  ;;  %v439_v60 = vadd.f32 %v438_v57, %v1984_v45  ;;  %v500_v0 = vmax.f32 %v322_v49, 0.0 }
 0x182   :  { %v503_v62 = vmax.f32 %v324_v54, 0.0  ;;  %v505_v63 = vmax.f32 %v437_v55, 0.0  ;;  %v2060_v54 = vrot.slane %v1201_v38, %v1972_v37  ;;  %v2064_v57 = vrot.slane %v1201_v38, %v1974_v40 }
 0x183   :  { %v504_v2 = vmax.f32 %v326_v59, 0.0  ;;  %v506_v3 = vmax.f32 %v439_v60, 0.0 }
 0x184   :  { %v539_v4 = vpack.c.bf16 %v503_v62, %v499_v61  ;;  %v541_v5 = vpack.c.bf16 %v505_v63, %v501_v53 }
 0x185   :  { %v540_v6 = vpack.c.bf16 %v504_v2, %v500_v0  ;;  %v542_v7 = vpack.c.bf16 %v506_v3, %v502_v58  ;;  %v329_v8 = vpop.f32.mrb[28].mxu0  ;;  %v442_v9 = vpop.f32.mrb[28].mxu1 }
 0x186   :  { %v330_v10 = vadd.f32 %v329_v8, %v1977_v42  ;;  %v443_v11 = vadd.f32 %v442_v9, %v1979_v43  ;;  %v331_v12 = vpop.f32.mrb[29].mxu0  ;;  %v444_v13 = vpop.f32.mrb[29].mxu1 }
 0x187   :  { %v332_v14 = vadd.f32 %v331_v12, %v1982_v44  ;;  %v445_v15 = vadd.f32 %v444_v13, %v1984_v45  ;;  %v333_v16 = vpop.f32.mrb[30].mxu0  ;;  %v446_v17 = vpop.f32.mrb[30].mxu1  ;;  %1035 = vmatprep.mubr.bf16.mxu1 %v540_v6  ;;  %1148 = vmatprep.mubr.bf16.mxu0 %v542_v7 }
 0x188   :  { %v509_v18 = vmax.f32 %v443_v11, 0.0  ;;  %v334_v19 = vadd.f32 %v333_v16, %v1977_v42  ;;  %v447_v20 = vadd.f32 %v446_v17, %v1979_v43  ;;  %v335_v21 = vpop.f32.mrb[31].mxu0  ;;  %v448_v22 = vpop.f32.mrb[31].mxu1  ;;  %1036 = vmatmul.mubr.bf16.gmra.mrb[56].mxu1 %v539_v4  ;;  %1149 = vmatmul.mubr.bf16.gmra.mrb[56].mxu0 %v541_v5  ;;  %v507_v26 = vmax.f32 %v330_v10, 0.0  ;;  %v611_v43 = vld [vmem:[#allocation11] sm:$0x3] }
 0x189   :  { %v510_v23 = vmax.f32 %v445_v15, 0.0  ;;  %v336_v24 = vadd.f32 %v335_v21, %v1982_v44  ;;  %v449_v25 = vadd.f32 %v448_v22, %v1984_v45  ;;  %v508_v29 = vmax.f32 %v332_v14, 0.0 }
 0x18a   :  { %v511_v27 = vmax.f32 %v334_v19, 0.0  ;;  %v513_v28 = vmax.f32 %v447_v20, 0.0  ;;  %v2051_v35 = vrot.slane %v611_v43, %v1972_v37  ;;  %v2054_v44 = vrot.slane %v611_v43, %v1974_v40 }
 0x18b   :  { %v512_v30 = vmax.f32 %v336_v24, 0.0  ;;  %v514_v31 = vmax.f32 %v449_v25, 0.0 }
 0x18c   :  { %v543_v32 = vpack.c.bf16 %v511_v27, %v507_v26  ;;  %v545_v33 = vpack.c.bf16 %v513_v28, %v509_v18 }
 0x18d   :  { %v544_v42 = vpack.c.bf16 %v512_v30, %v508_v29  ;;  %v546_v34 = vpack.c.bf16 %v514_v31, %v510_v23 }
 0x18f   :  { %1045 = vmatprep.mubr.bf16.mxu1 %v544_v42  ;;  %1158 = vmatprep.mubr.bf16.mxu0 %v546_v34 }
 0x190   :  { %1046 = vmatmul.mubr.bf16.gmra.mrb[60].mxu1 %v543_v32  ;;  %1159 = vmatmul.mubr.bf16.gmra.mrb[60].mxu0 %v545_v33 }
 0x22b   :  { %v977_v45 = vpop.f32.mrb[32].mxu1  ;;  %v1090_v36 = vpop.f32.mrb[32].mxu0 }
 0x22c   :  { %v978_v39 = vadd.f32 %v977_v45, %v2051_v35  ;;  %v979_v41 = vpop.f32.mrb[33].mxu1  ;;  %v1092_v46 = vpop.f32.mrb[33].mxu0 }
 0x22d   :  { %v980_v47 = vadd.f32 %v979_v41, %v2054_v44  ;;  %v981_v48 = vpop.f32.mrb[34].mxu1  ;;  %v1094_v49 = vpop.f32.mrb[34].mxu0 }
 0x22e   :  { %v1091_v50 = vadd.f32 %v1090_v36, %v978_v39  ;;  %v982_v51 = vadd.f32 %v981_v48, %v2051_v35  ;;  %v983_v52 = vpop.f32.mrb[35].mxu1  ;;  %v1096_v53 = vpop.f32.mrb[35].mxu0 }
 0x22f   :  { %v1093_v55 = vadd.f32 %v1092_v46, %v980_v47  ;;  %v984_v56 = vadd.f32 %v983_v52, %v2054_v44 }
 0x230   :  { %v1169_v58 = vmax.f32 %v1091_v50, 0.0  ;;  %v1095_v59 = vadd.f32 %v1094_v49, %v982_v51 }
 0x231   :  { %v1170_v60 = vmax.f32 %v1093_v55, 0.0  ;;  %v1097_v61 = vadd.f32 %v1096_v53, %v984_v56 }
 0x232   :  { %v1171_v62 = vmax.f32 %v1095_v59, 0.0  ;;  %v1213_v63 = vmul.f32 %v2060_v54, %v1169_v58 }
 0x233   :  { %v1172_v0 = vmax.f32 %v1097_v61, 0.0  ;;  %v987_v2 = vpop.f32.mrb[36].mxu1  ;;  %v1100_v3 = vpop.f32.mrb[36].mxu0  ;;  %v1214_v4 = vmul.f32 %v2064_v57, %v1170_v60 }
 0x234   :  { %v988_v5 = vadd.f32 %v987_v2, %v2051_v35  ;;  %v989_v6 = vpop.f32.mrb[37].mxu1  ;;  %v1102_v7 = vpop.f32.mrb[37].mxu0  ;;  %1245 = vxpose.xlu0.b32.start [1/16] %v1213_v63, 128  ;;  %v1215_v14 = vmul.f32 %v2060_v54, %v1171_v62 }
 0x235   :  { %v990_v40 = vadd.f32 %v989_v6, %v2054_v44  ;;  %v991_v8 = vpop.f32.mrb[38].mxu1  ;;  %v1104_v9 = vpop.f32.mrb[38].mxu0  ;;  %1277 = vxpose.xlu1.b32.start [1/16] %v1214_v4, 128  ;;  %v1216_v17 = vmul.f32 %v2064_v57, %v1172_v0 }
 0x236   :  { %v1101_v10 = vadd.f32 %v1100_v3, %v988_v5  ;;  %v992_v11 = vadd.f32 %v991_v8, %v2051_v35  ;;  %v993_v12 = vpop.f32.mrb[39].mxu1  ;;  %v1106_v13 = vpop.f32.mrb[39].mxu0 }
 0x237   :  { %v1103_v15 = vadd.f32 %v1102_v7, %v990_v40  ;;  %v994_v16 = vadd.f32 %v993_v12, %v2054_v44 }
 0x238   :  { %v1173_v18 = vmax.f32 %v1101_v10, 0.0  ;;  %v1105_v19 = vadd.f32 %v1104_v9, %v992_v11  ;;  %1246 = vxpose.xlu0.b32.cont [2/16] %v1215_v14, 128 }
 0x239   :  { %v1174_v20 = vmax.f32 %v1103_v15, 0.0  ;;  %v1107_v21 = vadd.f32 %v1106_v13, %v994_v16  ;;  %1278 = vxpose.xlu1.b32.cont [2/16] %v1216_v17, 128 }
 0x23a   :  { %v1175_v22 = vmax.f32 %v1105_v19, 0.0  ;;  %v1217_v23 = vmul.f32 %v2060_v54, %v1173_v18 }
 0x23b   :  { %v1176_v24 = vmax.f32 %v1107_v21, 0.0  ;;  %v997_v25 = vpop.f32.mrb[40].mxu1  ;;  %v1110_v26 = vpop.f32.mrb[40].mxu0  ;;  %v1218_v27 = vmul.f32 %v2064_v57, %v1174_v20 }
 0x23c   :  { %v998_v28 = vadd.f32 %v997_v25, %v2051_v35  ;;  %v999_v29 = vpop.f32.mrb[41].mxu1  ;;  %v1112_v30 = vpop.f32.mrb[41].mxu0  ;;  %1247 = vxpose.xlu0.b32.cont [3/16] %v1217_v23, 128  ;;  %v1219_v36 = vmul.f32 %v2060_v54, %v1175_v22 }
 0x23d   :  { %v1000_v31 = vadd.f32 %v999_v29, %v2054_v44  ;;  %v1001_v32 = vpop.f32.mrb[42].mxu1  ;;  %v1114_v33 = vpop.f32.mrb[42].mxu0  ;;  %1279 = vxpose.xlu1.b32.cont [3/16] %v1218_v27, 128  ;;  %v1220_v41 = vmul.f32 %v2064_v57, %v1176_v24 }
 0x23e   :  { %v1111_v42 = vadd.f32 %v1110_v26, %v998_v28  ;;  %v1002_v34 = vadd.f32 %v1001_v32, %v2051_v35  ;;  %v1003_v43 = vpop.f32.mrb[43].mxu1  ;;  %v1116_v45 = vpop.f32.mrb[43].mxu0 }
 0x23f   :  { %v1113_v38 = vadd.f32 %v1112_v30, %v1000_v31  ;;  %v1004_v39 = vadd.f32 %v1003_v43, %v2054_v44 }
 0x240   :  { %v1177_v46 = vmax.f32 %v1111_v42, 0.0  ;;  %v1115_v47 = vadd.f32 %v1114_v33, %v1002_v34  ;;  %1248 = vxpose.xlu0.b32.cont [4/16] %v1219_v36, 128 }
 0x241   :  { %v1178_v48 = vmax.f32 %v1113_v38, 0.0  ;;  %v1117_v49 = vadd.f32 %v1116_v45, %v1004_v39  ;;  %1280 = vxpose.xlu1.b32.cont [4/16] %v1220_v41, 128 }
 0x242   :  { %v1179_v50 = vmax.f32 %v1115_v47, 0.0  ;;  %v1221_v51 = vmul.f32 %v2060_v54, %v1177_v46 }
 0x243   :  { %v1180_v52 = vmax.f32 %v1117_v49, 0.0  ;;  %v1007_v53 = vpop.f32.mrb[44].mxu1  ;;  %v1120_v55 = vpop.f32.mrb[44].mxu0  ;;  %v1222_v56 = vmul.f32 %v2064_v57, %v1178_v48 }
 0x244   :  { %v1008_v58 = vadd.f32 %v1007_v53, %v2051_v35  ;;  %v1009_v59 = vpop.f32.mrb[45].mxu1  ;;  %v1122_v60 = vpop.f32.mrb[45].mxu0  ;;  %1249 = vxpose.xlu0.b32.cont [5/16] %v1221_v51, 128  ;;  %v1223_v5 = vmul.f32 %v2060_v54, %v1179_v50 }
 0x245   :  { %v1010_v61 = vadd.f32 %v1009_v59, %v2054_v44  ;;  %v1011_v62 = vpop.f32.mrb[46].mxu1  ;;  %v1124_v63 = vpop.f32.mrb[46].mxu0  ;;  %1281 = vxpose.xlu1.b32.cont [5/16] %v1222_v56, 128  ;;  %v1224_v40 = vmul.f32 %v2064_v57, %v1180_v52 }
 0x246   :  { %v1121_v0 = vadd.f32 %v1120_v55, %v1008_v58  ;;  %v1012_v2 = vadd.f32 %v1011_v62, %v2051_v35  ;;  %v1013_v3 = vpop.f32.mrb[47].mxu1  ;;  %v1126_v4 = vpop.f32.mrb[47].mxu0 }
 0x247   :  { %v1123_v6 = vadd.f32 %v1122_v60, %v1010_v61  ;;  %v1014_v7 = vadd.f32 %v1013_v3, %v2054_v44 }
 0x248   :  { %v1181_v8 = vmax.f32 %v1121_v0, 0.0  ;;  %v1125_v9 = vadd.f32 %v1124_v63, %v1012_v2  ;;  %1250 = vxpose.xlu0.b32.cont [6/16] %v1223_v5, 128 }
 0x249   :  { %v1182_v10 = vmax.f32 %v1123_v6, 0.0  ;;  %v1127_v11 = vadd.f32 %v1126_v4, %v1014_v7  ;;  %1282 = vxpose.xlu1.b32.cont [6/16] %v1224_v40, 128 }
 0x24a   :  { %v1183_v12 = vmax.f32 %v1125_v9, 0.0  ;;  %v1225_v13 = vmul.f32 %v2060_v54, %v1181_v8 }
 0x24b   :  { %v1184_v14 = vmax.f32 %v1127_v11, 0.0  ;;  %v1017_v15 = vpop.f32.mrb[48].mxu1  ;;  %v1130_v16 = vpop.f32.mrb[48].mxu0  ;;  %v1226_v17 = vmul.f32 %v2064_v57, %v1182_v10 }
 0x24c   :  { %v1018_v18 = vadd.f32 %v1017_v15, %v2051_v35  ;;  %v1019_v19 = vpop.f32.mrb[49].mxu1  ;;  %v1132_v20 = vpop.f32.mrb[49].mxu0  ;;  %1251 = vxpose.xlu0.b32.cont [7/16] %v1225_v13, 128  ;;  %v1227_v28 = vmul.f32 %v2060_v54, %v1183_v12 }
 0x24d   :  { %v1020_v21 = vadd.f32 %v1019_v19, %v2054_v44  ;;  %v1021_v22 = vpop.f32.mrb[50].mxu1  ;;  %v1134_v23 = vpop.f32.mrb[50].mxu0  ;;  %1283 = vxpose.xlu1.b32.cont [7/16] %v1226_v17, 128  ;;  %v1228_v31 = vmul.f32 %v2064_v57, %v1184_v14 }
 0x24e   :  { %v1131_v24 = vadd.f32 %v1130_v16, %v1018_v18  ;;  %v1022_v25 = vadd.f32 %v1021_v22, %v2051_v35  ;;  %v1023_v26 = vpop.f32.mrb[51].mxu1  ;;  %v1136_v27 = vpop.f32.mrb[51].mxu0 }
 0x24f   :  { %v1133_v29 = vadd.f32 %v1132_v20, %v1020_v21  ;;  %v1024_v30 = vadd.f32 %v1023_v26, %v2054_v44 }
 0x250   :  { %v1185_v32 = vmax.f32 %v1131_v24, 0.0  ;;  %v1135_v33 = vadd.f32 %v1134_v23, %v1022_v25  ;;  %1252 = vxpose.xlu0.b32.cont [8/16] %v1227_v28, 128 }
 0x251   :  { %v1186_v42 = vmax.f32 %v1133_v29, 0.0  ;;  %v1137_v34 = vadd.f32 %v1136_v27, %v1024_v30  ;;  %1284 = vxpose.xlu1.b32.cont [8/16] %v1228_v31, 128 }
 0x252   :  { %v1187_v43 = vmax.f32 %v1135_v33, 0.0  ;;  %v1229_v45 = vmul.f32 %v2060_v54, %v1185_v32 }
 0x253   :  { %v1188_v36 = vmax.f32 %v1137_v34, 0.0  ;;  %v1027_v38 = vpop.f32.mrb[52].mxu1  ;;  %v1140_v39 = vpop.f32.mrb[52].mxu0  ;;  %v1230_v41 = vmul.f32 %v2064_v57, %v1186_v42 }
 0x254   :  { %v1028_v46 = vadd.f32 %v1027_v38, %v2051_v35  ;;  %v1029_v47 = vpop.f32.mrb[53].mxu1  ;;  %v1142_v48 = vpop.f32.mrb[53].mxu0  ;;  %1253 = vxpose.xlu0.b32.cont [9/16] %v1229_v45, 128  ;;  %v1231_v58 = vmul.f32 %v2060_v54, %v1187_v43 }
 0x255   :  { %v1030_v49 = vadd.f32 %v1029_v47, %v2054_v44  ;;  %v1031_v50 = vpop.f32.mrb[54].mxu1  ;;  %v1144_v51 = vpop.f32.mrb[54].mxu0  ;;  %1285 = vxpose.xlu1.b32.cont [9/16] %v1230_v41, 128  ;;  %v1232_v61 = vmul.f32 %v2064_v57, %v1188_v36 }
 0x256   :  { %v1141_v52 = vadd.f32 %v1140_v39, %v1028_v46  ;;  %v1032_v53 = vadd.f32 %v1031_v50, %v2051_v35  ;;  %v1033_v55 = vpop.f32.mrb[55].mxu1  ;;  %v1146_v56 = vpop.f32.mrb[55].mxu0 }
 0x257   :  { %v1143_v59 = vadd.f32 %v1142_v48, %v1030_v49  ;;  %v1034_v60 = vadd.f32 %v1033_v55, %v2054_v44 }
 0x258   :  { %v1189_v62 = vmax.f32 %v1141_v52, 0.0  ;;  %v1145_v63 = vadd.f32 %v1144_v51, %v1032_v53  ;;  %1254 = vxpose.xlu0.b32.cont [10/16] %v1231_v58, 128 }
 0x259   :  { %v1190_v0 = vmax.f32 %v1143_v59, 0.0  ;;  %v1147_v2 = vadd.f32 %v1146_v56, %v1034_v60  ;;  %1286 = vxpose.xlu1.b32.cont [10/16] %v1232_v61, 128  ;;  %v1346_v60 = vld [vmem:[#allocation2] sm:$0x1] }
 0x25a   :  { %v1191_v3 = vmax.f32 %v1145_v63, 0.0  ;;  %v1233_v4 = vmul.f32 %v2060_v54, %v1189_v62 }
 0x25b   :  { %v1192_v5 = vmax.f32 %v1147_v2, 0.0  ;;  %v1037_v6 = vpop.f32.mrb[56].mxu1  ;;  %v1150_v7 = vpop.f32.mrb[56].mxu0  ;;  %v1234_v40 = vmul.f32 %v2064_v57, %v1190_v0 }
 0x25c   :  { %v1038_v8 = vadd.f32 %v1037_v6, %v2051_v35  ;;  %v1039_v9 = vpop.f32.mrb[57].mxu1  ;;  %v1152_v10 = vpop.f32.mrb[57].mxu0  ;;  %1255 = vxpose.xlu0.b32.cont [11/16] %v1233_v4, 128  ;;  %v1235_v18 = vmul.f32 %v2060_v54, %v1191_v3 }
 0x25d   :  { %v1040_v11 = vadd.f32 %v1039_v9, %v2054_v44  ;;  %v1041_v12 = vpop.f32.mrb[58].mxu1  ;;  %v1154_v13 = vpop.f32.mrb[58].mxu0  ;;  %1287 = vxpose.xlu1.b32.cont [11/16] %v1234_v40, 128  ;;  %v1236_v21 = vmul.f32 %v2064_v57, %v1192_v5 }
 0x25e   :  { %v1151_v14 = vadd.f32 %v1150_v7, %v1038_v8  ;;  %v1042_v15 = vadd.f32 %v1041_v12, %v2051_v35  ;;  %v1043_v16 = vpop.f32.mrb[59].mxu1  ;;  %v1156_v17 = vpop.f32.mrb[59].mxu0 }
 0x25f   :  { %v1153_v19 = vadd.f32 %v1152_v10, %v1040_v11  ;;  %v1044_v20 = vadd.f32 %v1043_v16, %v2054_v44 }
 0x260   :  { %v1193_v22 = vmax.f32 %v1151_v14, 0.0  ;;  %v1155_v23 = vadd.f32 %v1154_v13, %v1042_v15  ;;  %1256 = vxpose.xlu0.b32.cont [12/16] %v1235_v18, 128 }
 0x261   :  { %v1194_v24 = vmax.f32 %v1153_v19, 0.0  ;;  %v1157_v25 = vadd.f32 %v1156_v17, %v1044_v20  ;;  %1288 = vxpose.xlu1.b32.cont [12/16] %v1236_v21, 128 }
 0x262   :  { %v1195_v26 = vmax.f32 %v1155_v23, 0.0  ;;  %v1237_v27 = vmul.f32 %v2060_v54, %v1193_v22 }
 0x263   :  { %v1196_v28 = vmax.f32 %v1157_v25, 0.0  ;;  %v1047_v29 = vpop.f32.mrb[60].mxu1  ;;  %v1160_v30 = vpop.f32.mrb[60].mxu0  ;;  %v1238_v31 = vmul.f32 %v2064_v57, %v1194_v24 }
 0x264   :  { %v1048_v32 = vadd.f32 %v1047_v29, %v2051_v35  ;;  %v1049_v33 = vpop.f32.mrb[61].mxu1  ;;  %v1162_v42 = vpop.f32.mrb[61].mxu0  ;;  %1257 = vxpose.xlu0.b32.cont [13/16] %v1237_v27, 128  ;;  %v1239_v46 = vmul.f32 %v2060_v54, %v1195_v26 }
 0x265   :  { %v1050_v34 = vadd.f32 %v1049_v33, %v2054_v44  ;;  %v1051_v43 = vpop.f32.mrb[62].mxu1  ;;  %v1164_v45 = vpop.f32.mrb[62].mxu0  ;;  %1289 = vxpose.xlu1.b32.cont [13/16] %v1238_v31, 128  ;;  %v1240_v49 = vmul.f32 %v2064_v57, %v1196_v28 }
 0x266   :  { %v1161_v36 = vadd.f32 %v1160_v30, %v1048_v32  ;;  %v1052_v38 = vadd.f32 %v1051_v43, %v2051_v35  ;;  %v1053_v39 = vpop.f32.mrb[63].mxu1  ;;  %v1166_v41 = vpop.f32.mrb[63].mxu0 }
 0x267   :  { %v1163_v47 = vadd.f32 %v1162_v42, %v1050_v34  ;;  %v1054_v48 = vadd.f32 %v1053_v39, %v2054_v44 }
 0x268   :  { %v1197_v50 = vmax.f32 %v1161_v36, 0.0  ;;  %v1165_v51 = vadd.f32 %v1164_v45, %v1052_v38  ;;  %1258 = vxpose.xlu0.b32.cont [14/16] %v1239_v46, 128 }
 0x269   :  { %v1198_v52 = vmax.f32 %v1163_v47, 0.0  ;;  %v1167_v53 = vadd.f32 %v1166_v41, %v1054_v48  ;;  %1290 = vxpose.xlu1.b32.cont [14/16] %v1240_v49, 128 }
 0x26a   :  { %v1199_v55 = vmax.f32 %v1165_v51, 0.0  ;;  %v1241_v56 = vmul.f32 %v2060_v54, %v1197_v50 }
 0x26b   :  { %v1200_v58 = vmax.f32 %v1167_v53, 0.0  ;;  %v1242_v35 = vmul.f32 %v2064_v57, %v1198_v52 }
 0x26c   :  { %1259 = vxpose.xlu0.b32.cont [15/16] %v1241_v56, 128  ;;  %v1243_v59 = vmul.f32 %v2060_v54, %v1199_v55 }
 0x26d   :  { %1291 = vxpose.xlu1.b32.cont [15/16] %v1242_v35, 128  ;;  %v1244_v44 = vmul.f32 %v2064_v57, %v1200_v58 }
 0x270   :  { %1260 = vxpose.xlu0.b32.end [16/16] %v1243_v59, 128 }
 0x271   :  { %1292 = vxpose.xlu1.b32.end [16/16] %v1244_v44, 128 }
 0x299   :  { %1540 = vset.pattern.permute.xlu0 %v1823_v1 }
 0x29a   :  { %1349 = vperm.xlu0 %1540, %v1346_v60  }
 0x2b4   :  { %v1261_v61 = vpop.trf.xlu0 }
 0x2b5   :  { %v1293_v62 = vpop.trf.xlu1 }
 0x2b8   :  { %v1262_v63 = vpop.trf.xlu0 }
 0x2b9   :  { %v1294_v0 = vpop.trf.xlu1  ;;  %v1309_v10 = vadd.f32 %v1262_v63, %v1261_v61 }
 0x2bc   :  { %v1263_v2 = vpop.trf.xlu0 }
 0x2bd   :  { %v1295_v4 = vpop.trf.xlu1  ;;  %v1310_v11 = vadd.f32 %v1309_v10, %v1263_v2 }
 0x2c0   :  { %v1264_v3 = vpop.trf.xlu0 }
 0x2c1   :  { %v1296_v6 = vpop.trf.xlu1  ;;  %v1311_v13 = vadd.f32 %v1310_v11, %v1264_v3 }
 0x2c4   :  { %v1265_v5 = vpop.trf.xlu0 }
 0x2c5   :  { %v1297_v54 = vpop.trf.xlu1  ;;  %v1312_v14 = vadd.f32 %v1311_v13, %v1265_v5 }
 0x2c8   :  { %v1266_v7 = vpop.trf.xlu0 }
 0x2c9   :  { %v1298_v57 = vpop.trf.xlu1  ;;  %v1313_v16 = vadd.f32 %v1312_v14, %v1266_v7 }
 0x2cc   :  { %v1267_v40 = vpop.trf.xlu0 }
 0x2cd   :  { %v1299_v1 = vpop.trf.xlu1  ;;  %v1314_v18 = vadd.f32 %v1313_v16, %v1267_v40 }
 0x2d0   :  { %v1268_v8 = vpop.trf.xlu0 }
 0x2d1   :  { %v1300_v17 = vpop.trf.xlu1  ;;  %v1315_v20 = vadd.f32 %v1314_v18, %v1268_v8 }
 0x2d4   :  { %v1269_v9 = vpop.trf.xlu0 }
 0x2d5   :  { %v1316_v21 = vadd.f32 %v1315_v20, %v1269_v9  ;;  %v1301_v23 = vpop.trf.xlu1 }
 0x2d8   :  { %v1270_v12 = vpop.trf.xlu0 }
 0x2d9   :  { %v1317_v24 = vadd.f32 %v1316_v21, %v1270_v12  ;;  %v1302_v28 = vpop.trf.xlu1 }
 0x2dc   :  { %v1271_v15 = vpop.trf.xlu0 }
 0x2dd   :  { %v1318_v25 = vadd.f32 %v1317_v24, %v1271_v15  ;;  %v1303_v42 = vpop.trf.xlu1 }
 0x2e0   :  { %v1272_v19 = vpop.trf.xlu0 }
 0x2e1   :  { %v1319_v27 = vadd.f32 %v1318_v25, %v1272_v19  ;;  %v1304_v36 = vpop.trf.xlu1 }
 0x2e4   :  { %v1273_v22 = vpop.trf.xlu0 }
 0x2e5   :  { %v1320_v29 = vadd.f32 %v1319_v27, %v1273_v22  ;;  %v1305_v46 = vpop.trf.xlu1 }
 0x2e8   :  { %v1274_v26 = vpop.trf.xlu0 }
 0x2e9   :  { %v1321_v31 = vadd.f32 %v1320_v29, %v1274_v26  ;;  %v1306_v50 = vpop.trf.xlu1 }
 0x2ec   :  { %v1275_v30 = vpop.trf.xlu0 }
 0x2ed   :  { %v1322_v32 = vadd.f32 %v1321_v31, %v1275_v30  ;;  %v1307_v55 = vpop.trf.xlu1 }
 0x2f0   :  { %v1276_v33 = vpop.trf.xlu0 }
 0x2f1   :  { %v1323_v34 = vadd.f32 %v1322_v32, %v1276_v33  ;;  %v1308_v59 = vpop.trf.xlu1 }
 0x2f3   :  { %v1324_v43 = vadd.f32 %v1323_v34, %v1293_v62 }
 0x2f5   :  { %v1325_v45 = vadd.f32 %v1324_v43, %v1294_v0 }
 0x2f7   :  { %v1326_v38 = vadd.f32 %v1325_v45, %v1295_v4 }
 0x2f9   :  { %v1327_v39 = vadd.f32 %v1326_v38, %v1296_v6 }
 0x2fb   :  { %v1328_v41 = vadd.f32 %v1327_v39, %v1297_v54 }
 0x2fd   :  { %v1329_v47 = vadd.f32 %v1328_v41, %v1298_v57 }
 0x2ff   :  { %v1330_v48 = vadd.f32 %v1329_v47, %v1299_v1 }
 0x301   :  { %v1331_v49 = vadd.f32 %v1330_v48, %v1300_v17 }
 0x303   :  { %v1332_v51 = vadd.f32 %v1331_v49, %v1301_v23 }
 0x305   :  { %v1333_v52 = vadd.f32 %v1332_v51, %v1302_v28 }
 0x307   :  { %v1334_v53 = vadd.f32 %v1333_v52, %v1303_v42 }
 0x309   :  { %v1335_v56 = vadd.f32 %v1334_v53, %v1304_v36 }
 0x30b   :  { %v1336_v58 = vadd.f32 %v1335_v56, %v1305_v46 }
 0x30d   :  { %v1337_v35 = vadd.f32 %v1336_v58, %v1306_v50 }
 0x30f   :  { %v1338_v44 = vadd.f32 %v1337_v35, %v1307_v55 }
 0x311   :  { %v1339_v60 = vadd.f32 %v1338_v44, %v1308_v59 }
 0x313   :  { %v1340_v61 = vrot.slane %v1339_v60, 4 }
 0x315   :  { %v1341_v62 = vadd.f32 %v1340_v61, %v1339_v60 }
 0x317   :  { %v1342_v63 = vrot.slane %v1341_v62, 2 }
 0x319   :  { %v1343_v0 = vadd.f32 %v1342_v63, %v1341_v62  ;;  %v1350_v2 = vpop.permute.xlu0 %1349 }
 0x31a   :  { %v1355_v4 = vrot.slane %v1350_v2, %v1972_v37 }
 0x31b   :  { %v1344_v3 = vrot.slane %v1343_v0, 1 }
 0x31d   :  { %v1345_v5 = vadd.f32 %v1344_v3, %v1343_v0 }
 0x31f   :  { %v1356_v6 = vadd.f32 %v1355_v4, %v1345_v5 }
 0x321   :  { %1357 = vst [vmem:[#allocation14] sm:$0x1] %v1356_v6 }
 0x322   :  { %1792 = shalt.err (!%p1789_p10)
}
 0x323   :  { %s1793_s19 = scalar_lea.hbm %s2147_s7, 16 }
 0x324   :  { %p1794_p11 = scmp.ne.s32.totalorder %s2147_s7, %s1793_s19  ;;  %p1797_p12 = scmp.lt.u32.totalorder %s1793_s19, %s2147_s7 }
 0x326   :  { %p1799_p13 = pnand %p1797_p12, %p1794_p11 }
 0x328   :  { %1802 = shalt.err (!%p1799_p13)
}
 0x329   :  { %1367 = dma.vmem_to_hbm [thread:$0]  %s1365_s24, 16, %s2147_s7, [#allocation5]  }
 0x32a   :  { %1811 = dma.done.wait [#allocation5], 16  }
 0x32b   :  { %1812 = vsyncadd [#allocation5], 4294967280 }
 0x32c   :  { %1371 = vsyncpa [#allocation4], 1 }
 0x32d   :  { %1372 = vsyncpa [#allocation7], 1 }
 0x32e   :  { %1373 = vsyncpa [#allocation10], 1 }
 0x32f   :  { %1374 = vsyncpa [#allocation13], 1 }
 0x330   :  { %1375 = vsyncpa [#allocation5], 1 }

</bundles_post_ra>
